<compile_context>
chip_gen: v5e
topology: v5e:2x2
jax: 0.10.0
libtpu: 0.0.40
codegen_flags: <defaults>
</compile_context>

<pallas_src>
import jax
import jax.numpy as jnp
from jax.experimental import pallas as pl
from jax.experimental.pallas import tpu as pltpu

_HI = jax.lax.Precision.HIGHEST  # exact-f32 matmuls (reference is f32 too)


def _softsign(v):
    return v / (1.0 + jnp.abs(v))


def _pick_batch_tile(B, per_batch_bytes, target_bytes=1 << 20):
    """Largest divisor of B whose input block stays under ~target bytes,
    preferring at least 2 grid steps (keep both TensorCores busy)."""
    cap = max(1, target_bytes // max(per_batch_bytes, 1))
    best = 1
    for bt in range(1, B + 1):
        if B % bt or bt > cap:
            continue
        if B // bt >= 2 or B == 1:
            best = bt
    return best


# ------------------------------ fused kernel ------------------------------------
def _cpc_kernel(x_ref, wa_ref, gb_ref, gc_ref, gt_ref, ht_ref,
                ba_ref, bb_ref, bc_ref, o_ref):
    # x_ref: (Bt, T, NxNy) input dtype.  All parameter refs are small f32 constants
    # (index_map is grid-invariant, so they are DMA'd into VMEM only once).
    x = x_ref[...]

    # ---- pooling over the VMEM-resident block (f32 accumulation) ----
    sa = jnp.sum(x, axis=2, dtype=jnp.float32)        # (Bt, T)     lane reduce
    st = jnp.sum(x, axis=1, dtype=jnp.float32)        # (Bt, NxNy)  sublane reduce

    # ---- 1x1 convs (pool normalization folded into the weights) + Softsign ----
    a = _softsign(jnp.dot(sa, wa_ref[...], precision=_HI,
                          preferred_element_type=jnp.float32) + ba_ref[...])   # (Bt, T)
    bv = _softsign(jnp.dot(st, gb_ref[...], precision=_HI,
                           preferred_element_type=jnp.float32) + bb_ref[...])  # (Bt, Nx)
    cv = _softsign(jnp.dot(st, gc_ref[...], precision=_HI,
                           preferred_element_type=jnp.float32) + bc_ref[...])  # (Bt, Ny)

    # ---- rank-1 expansion along the flattened (Nx*Ny) lane axis, reshape-free ----
    # gt: (Nx, NxNy) 0/1 with gt[x, k] = 1 iff k // Ny == x  -> bv_rep[b,k] = bv[b, k//Ny]
    # ht: (Ny, NxNy) 0/1 with ht[y, k] = 1 iff k %  Ny == y  -> cv_rep[b,k] = cv[b, k% Ny]
    bv_rep = jnp.dot(bv, gt_ref[...], precision=_HI, preferred_element_type=jnp.float32)
    cv_rep = jnp.dot(cv, ht_ref[...], precision=_HI, preferred_element_type=jnp.float32)
    d = bv_rep * cv_rep                                # (Bt, NxNy)

    # ---- lane-dense broadcast multiply + store ----
    o_ref[...] = (a[:, :, None] * d[:, None, :]).astype(o_ref.dtype)


# --------------------------------- wrapper ---------------------------------------
def cpc_forward(x, wa, ba, wb, bb, wc, bc):
    """x: (B, T, Nx, Ny); wa:(T,T) ba:(T,); wb:(Nx,Nx) bb:(Nx,); wc:(Ny,Ny) bc:(Ny,)."""
    B, T, Nx, Ny = x.shape
    NxNy = Nx * Ny
    itemsize = x.dtype.itemsize
    f32 = jnp.float32

    # ---- tiny one-time parameter folding (XLA, O(NxNy*(Nx+Ny)) elements) ----
    # a_pre  = sa @ WA + ba            with WA[i,o] = wa[o,i] / (Nx*Ny)
    # b_pre  = st @ GB + bb            with GB[k,o] = wb[o, k//Ny] / (T*Ny)
    # c_pre  = st @ GC + bc            with GC[k,o] = wc[o, k% Ny] / (T*Nx)
    WA = (wa.T / (Nx * Ny)).astype(f32)                              # (T, T)
    GB = (jnp.repeat(wb.T.astype(f32), Ny, axis=0) / (T * Ny))       # (NxNy, Nx)
    GC = (jnp.tile(wc.T.astype(f32), (Nx, 1)) / (T * Nx))            # (NxNy, Ny)
    GT = jnp.repeat(jnp.eye(Nx, dtype=f32), Ny, axis=1)              # (Nx, NxNy)
    HT = jnp.tile(jnp.eye(Ny, dtype=f32), (1, Nx))                   # (Ny, NxNy)
    BA = ba.astype(f32).reshape(1, T)
    BB = bb.astype(f32).reshape(1, Nx)
    BC = bc.astype(f32).reshape(1, Ny)

    # Free XLA reshape: lane-dense last dim of size Nx*Ny.
    x3 = x.reshape(B, T, NxNy)

    per_batch_bytes = T * NxNy * itemsize
    Bt = _pick_batch_tile(B, per_batch_bytes)
    nb = B // Bt
    blk_bytes = Bt * per_batch_bytes
    const_bytes = 4 * (T * T + 2 * NxNy * (Nx + Ny) + T + Nx + Ny)
    vmem_limit = int(min(64 * 2**20, max(16 * 2**20, 8 * blk_bytes + 2 * const_bytes)))

    def _const(shape):
        return pl.BlockSpec(shape, lambda i: (0, 0))

    out3 = pl.pallas_call(
        _cpc_kernel,
        out_shape=jax.ShapeDtypeStruct((B, T, NxNy), x.dtype),
        grid=(nb,),
        in_specs=[
            pl.BlockSpec((Bt, T, NxNy), lambda i: (i, 0, 0)),   # x
            _const((T, T)),                                     # WA
            _const((NxNy, Nx)),                                 # GB
            _const((NxNy, Ny)),                                 # GC
            _const((Nx, NxNy)),                                 # GT
            _const((Ny, NxNy)),                                 # HT
            _const((1, T)),                                     # BA
            _const((1, Nx)),                                    # BB
            _const((1, Ny)),                                    # BC
        ],
        out_specs=pl.BlockSpec((Bt, T, NxNy), lambda i: (i, 0, 0)),
        compiler_params=pltpu.CompilerParams(
            dimension_semantics=("parallel",),
            vmem_limit_bytes=vmem_limit,
        ),
        cost_estimate=pl.CostEstimate(
            flops=int(4 * B * T * NxNy + 4 * B * NxNy * (Nx + Ny)),
            transcendentals=0,
            bytes_accessed=int(2 * B * T * NxNy * itemsize + 2 * const_bytes),
        ),
    )(x3, WA, GB, GC, GT, HT, BA, BB, BC)

    # Free XLA reshape back to the module's (B, T, Nx, Ny) layout.
    return out3.reshape(B, T, Nx, Ny)


# ------------------------------- pure-JAX reference ------------------------------
def cpc_reference(x, wa, ba, wb, bb, wc, bc):
    pa = x.mean(axis=(2, 3))                                     # (B, T)
    pb = x.mean(axis=(1, 3))                                     # (B, Nx)
    pc = x.mean(axis=(1, 2))                                     # (B, Ny)
    a = _softsign(jnp.dot(pa, wa.T, precision=_HI) + ba)         # (B, T)
    bv = _softsign(jnp.dot(pb, wb.T, precision=_HI) + bb)        # (B, Nx)
    cv = _softsign(jnp.dot(pc, wc.T, precision=_HI) + bc)        # (B, Ny)
    return a[:, :, None, None] * bv[:, None, :, None] * cv[:, None, None, :]


if __name__ == "__main__":
    B, T, Nx, Ny = 2, 4, 16, 16
    key = jax.random.PRNGKey(0)
    ks = jax.random.split(key, 7)

    x = jax.random.normal(ks[0], (B, T, Nx, Ny), jnp.float32)
    # Deterministic synthetic conv1x1 parameters (weight (C_out, C_in), bias (C_out,)).
    wa = 0.5 * jax.random.normal(ks[1], (T, T), jnp.float32)
    ba = 0.1 * jax.random.normal(ks[2], (T,), jnp.float32)
    wb = 0.5 * jax.random.normal(ks[3], (Nx, Nx), jnp.float32)
    bb = 0.1 * jax.random.normal(ks[4], (Nx,), jnp.float32)
    wc = 0.5 * jax.random.normal(ks[5], (Ny, Ny), jnp.float32)
    bc = 0.1 * jax.random.normal(ks[6], (Ny,), jnp.float32)

    out = jax.jit(cpc_forward)(x, wa, ba, wb, bb, wc, bc)
    out = jax.block_until_ready(out)

    ref = cpc_reference(x, wa, ba, wb, bb, wc, bc)
    assert out.shape == (B, T, Nx, Ny), out.shape
    assert jnp.allclose(out, ref, rtol=1e-5, atol=1e-5), (
        float(jnp.max(jnp.abs(out - ref)))
    )
    print("KERNEL_OK")
</pallas_src>

<mosaic_0001>
module attributes {stable_mosaic.version = 11 : i64} {
  func.func @_cpc_kernel(%arg0: i32, %arg1: memref<1x4x256xf32, #tpu.memory_space<vmem>>, %arg2: memref<4x4xf32, #tpu.memory_space<vmem>>, %arg3: memref<256x16xf32, #tpu.memory_space<vmem>>, %arg4: memref<256x16xf32, #tpu.memory_space<vmem>>, %arg5: memref<16x256xf32, #tpu.memory_space<vmem>>, %arg6: memref<16x256xf32, #tpu.memory_space<vmem>>, %arg7: memref<1x4xf32, #tpu.memory_space<vmem>>, %arg8: memref<1x16xf32, #tpu.memory_space<vmem>>, %arg9: memref<1x16xf32, #tpu.memory_space<vmem>>, %arg10: memref<1x4x256xf32, #tpu.memory_space<vmem>>) attributes {dimension_semantics = [#tpu.dimension_semantics<parallel>], iteration_bounds = array<i64: 2>, scalar_prefetch = 0 : i64, scratch_operands = 0 : i64, tpu.core_type = #tpu.core_type<tc>, window_params = [{transform_indices = @transform_0, window_bounds = array<i64: 1, 4, 256>}, {pipeline_mode = #tpu.pipeline_mode<synchronous>, transform_indices = @transform_1, window_bounds = array<i64: 4, 4>}, {pipeline_mode = #tpu.pipeline_mode<synchronous>, transform_indices = @transform_2, window_bounds = array<i64: 256, 16>}, {pipeline_mode = #tpu.pipeline_mode<synchronous>, transform_indices = @transform_3, window_bounds = array<i64: 256, 16>}, {pipeline_mode = #tpu.pipeline_mode<synchronous>, transform_indices = @transform_4, window_bounds = array<i64: 16, 256>}, {pipeline_mode = #tpu.pipeline_mode<synchronous>, transform_indices = @transform_5, window_bounds = array<i64: 16, 256>}, {pipeline_mode = #tpu.pipeline_mode<synchronous>, transform_indices = @transform_6, window_bounds = array<i64: 1, 4>}, {pipeline_mode = #tpu.pipeline_mode<synchronous>, transform_indices = @transform_7, window_bounds = array<i64: 1, 16>}, {pipeline_mode = #tpu.pipeline_mode<synchronous>, transform_indices = @transform_8, window_bounds = array<i64: 1, 16>}, {transform_indices = @transform_9, window_bounds = array<i64: 1, 4, 256>}]} {
    %c0 = arith.constant 0 : index
    %c0_0 = arith.constant 0 : index
    %c0_1 = arith.constant 0 : index
    %0 = vector.load %arg1[%c0, %c0_0, %c0_1] : memref<1x4x256xf32, #tpu.memory_space<vmem>>, vector<1x4x256xf32>
    %cst = arith.constant dense<0.000000e+00> : vector<1x4xf32>
    %1 = vector.multi_reduction <add>, %0, %cst [2] : vector<1x4x256xf32> to vector<1x4xf32>
    %cst_2 = arith.constant dense<0.000000e+00> : vector<1x256xf32>
    %2 = vector.multi_reduction <add>, %0, %cst_2 [1] : vector<1x4x256xf32> to vector<1x256xf32>
    %c0_3 = arith.constant 0 : index
    %c0_4 = arith.constant 0 : index
    %3 = vector.load %arg2[%c0_3, %c0_4] : memref<4x4xf32, #tpu.memory_space<vmem>>, vector<4x4xf32>
    %cst_5 = arith.constant dense<0.000000e+00> : vector<1x4xf32>
    %4 = tpu.matmul %1, %3, %cst_5 {dimension_numbers = #tpu.dot_dimension_numbers<[1], [0], [0], [1], [0, 0, 1, 1], [], []>, precision = #tpu.contract_precision<fp32>} : vector<1x4xf32>, vector<4x4xf32>, vector<1x4xf32> -> vector<1x4xf32>
    %c0_6 = arith.constant 0 : index
    %c0_7 = arith.constant 0 : index
    %5 = vector.load %arg7[%c0_6, %c0_7] : memref<1x4xf32, #tpu.memory_space<vmem>>, vector<1x4xf32>
    %6 = arith.addf %4, %5 : vector<1x4xf32>
    %7 = math.absf %6 : vector<1x4xf32>
    %cst_8 = arith.constant 1.000000e+00 : f32
    %8 = vector.broadcast %cst_8 : f32 to vector<1x4xf32>
    %9 = arith.addf %8, %7 : vector<1x4xf32>
    %10 = arith.divf %6, %9 : vector<1x4xf32>
    %c0_9 = arith.constant 0 : index
    %c0_10 = arith.constant 0 : index
    %11 = vector.load %arg3[%c0_9, %c0_10] : memref<256x16xf32, #tpu.memory_space<vmem>>, vector<256x16xf32>
    %cst_11 = arith.constant dense<0.000000e+00> : vector<1x16xf32>
    %12 = tpu.matmul %2, %11, %cst_11 {dimension_numbers = #tpu.dot_dimension_numbers<[1], [0], [0], [1], [0, 0, 1, 1], [], []>, precision = #tpu.contract_precision<fp32>} : vector<1x256xf32>, vector<256x16xf32>, vector<1x16xf32> -> vector<1x16xf32>
    %c0_12 = arith.constant 0 : index
    %c0_13 = arith.constant 0 : index
    %13 = vector.load %arg8[%c0_12, %c0_13] : memref<1x16xf32, #tpu.memory_space<vmem>>, vector<1x16xf32>
    %14 = arith.addf %12, %13 : vector<1x16xf32>
    %15 = math.absf %14 : vector<1x16xf32>
    %cst_14 = arith.constant 1.000000e+00 : f32
    %16 = vector.broadcast %cst_14 : f32 to vector<1x16xf32>
    %17 = arith.addf %16, %15 : vector<1x16xf32>
    %18 = arith.divf %14, %17 : vector<1x16xf32>
    %c0_15 = arith.constant 0 : index
    %c0_16 = arith.constant 0 : index
    %19 = vector.load %arg4[%c0_15, %c0_16] : memref<256x16xf32, #tpu.memory_space<vmem>>, vector<256x16xf32>
    %cst_17 = arith.constant dense<0.000000e+00> : vector<1x16xf32>
    %20 = tpu.matmul %2, %19, %cst_17 {dimension_numbers = #tpu.dot_dimension_numbers<[1], [0], [0], [1], [0, 0, 1, 1], [], []>, precision = #tpu.contract_precision<fp32>} : vector<1x256xf32>, vector<256x16xf32>, vector<1x16xf32> -> vector<1x16xf32>
    %c0_18 = arith.constant 0 : index
    %c0_19 = arith.constant 0 : index
    %21 = vector.load %arg9[%c0_18, %c0_19] : memref<1x16xf32, #tpu.memory_space<vmem>>, vector<1x16xf32>
    %22 = arith.addf %20, %21 : vector<1x16xf32>
    %23 = math.absf %22 : vector<1x16xf32>
    %cst_20 = arith.constant 1.000000e+00 : f32
    %24 = vector.broadcast %cst_20 : f32 to vector<1x16xf32>
    %25 = arith.addf %24, %23 : vector<1x16xf32>
    %26 = arith.divf %22, %25 : vector<1x16xf32>
    %c0_21 = arith.constant 0 : index
    %c0_22 = arith.constant 0 : index
    %27 = vector.load %arg5[%c0_21, %c0_22] : memref<16x256xf32, #tpu.memory_space<vmem>>, vector<16x256xf32>
    %cst_23 = arith.constant dense<0.000000e+00> : vector<1x256xf32>
    %28 = tpu.matmul %18, %27, %cst_23 {dimension_numbers = #tpu.dot_dimension_numbers<[1], [0], [0], [1], [0, 0, 1, 1], [], []>, precision = #tpu.contract_precision<fp32>} : vector<1x16xf32>, vector<16x256xf32>, vector<1x256xf32> -> vector<1x256xf32>
    %c0_24 = arith.constant 0 : index
    %c0_25 = arith.constant 0 : index
    %29 = vector.load %arg6[%c0_24, %c0_25] : memref<16x256xf32, #tpu.memory_space<vmem>>, vector<16x256xf32>
    %cst_26 = arith.constant dense<0.000000e+00> : vector<1x256xf32>
    %30 = tpu.matmul %26, %29, %cst_26 {dimension_numbers = #tpu.dot_dimension_numbers<[1], [0], [0], [1], [0, 0, 1, 1], [], []>, precision = #tpu.contract_precision<fp32>} : vector<1x16xf32>, vector<16x256xf32>, vector<1x256xf32> -> vector<1x256xf32>
    %31 = arith.mulf %28, %30 : vector<1x256xf32>
    %32 = vector.shape_cast %10 : vector<1x4xf32> to vector<1x4x1xf32>
    %33 = vector.shape_cast %31 : vector<1x256xf32> to vector<1x1x256xf32>
    %34 = vector.broadcast %32 : vector<1x4x1xf32> to vector<1x4x256xf32>
    %35 = vector.broadcast %33 : vector<1x1x256xf32> to vector<1x4x256xf32>
    %36 = arith.mulf %34, %35 : vector<1x4x256xf32>
    %c0_27 = arith.constant 0 : index
    %c0_28 = arith.constant 0 : index
    %c0_29 = arith.constant 0 : index
    %37 = vector.load %arg10[%c0_27, %c0_28, %c0_29] : memref<1x4x256xf32, #tpu.memory_space<vmem>>, vector<1x4x256xf32>
    tpu.vector_store %arg10[%c0_27, %c0_28, %c0_29], %36 {strides = array<i32>} : memref<1x4x256xf32, #tpu.memory_space<vmem>>, vector<1x4x256xf32>,
    return
  }
  func.func @transform_0(%arg0: i32) -> (i32, i32, i32) {
    %c0_i32 = arith.constant 0 : i32
    %c0_i32_0 = arith.constant 0 : i32
    %c0_i32_1 = arith.constant 0 : i32
    return %arg0, %c0_i32, %c0_i32_0 : i32, i32, i32
  }
  func.func @transform_1(%arg0: i32) -> (i32, i32) {
    %c0_i32 = arith.constant 0 : i32
    %c0_i32_0 = arith.constant 0 : i32
    %c0_i32_1 = arith.constant 0 : i32
    return %c0_i32, %c0_i32_0 : i32, i32
  }
  func.func @transform_2(%arg0: i32) -> (i32, i32) {
    %c0_i32 = arith.constant 0 : i32
    %c0_i32_0 = arith.constant 0 : i32
    %c0_i32_1 = arith.constant 0 : i32
    return %c0_i32, %c0_i32_0 : i32, i32
  }
  func.func @transform_3(%arg0: i32) -> (i32, i32) {
    %c0_i32 = arith.constant 0 : i32
    %c0_i32_0 = arith.constant 0 : i32
    %c0_i32_1 = arith.constant 0 : i32
    return %c0_i32, %c0_i32_0 : i32, i32
  }
  func.func @transform_4(%arg0: i32) -> (i32, i32) {
    %c0_i32 = arith.constant 0 : i32
    %c0_i32_0 = arith.constant 0 : i32
    %c0_i32_1 = arith.constant 0 : i32
    return %c0_i32, %c0_i32_0 : i32, i32
  }
  func.func @transform_5(%arg0: i32) -> (i32, i32) {
    %c0_i32 = arith.constant 0 : i32
    %c0_i32_0 = arith.constant 0 : i32
    %c0_i32_1 = arith.constant 0 : i32
    return %c0_i32, %c0_i32_0 : i32, i32
  }
  func.func @transform_6(%arg0: i32) -> (i32, i32) {
    %c0_i32 = arith.constant 0 : i32
    %c0_i32_0 = arith.constant 0 : i32
    %c0_i32_1 = arith.constant 0 : i32
    return %c0_i32, %c0_i32_0 : i32, i32
  }
  func.func @transform_7(%arg0: i32) -> (i32, i32) {
    %c0_i32 = arith.constant 0 : i32
    %c0_i32_0 = arith.constant 0 : i32
    %c0_i32_1 = arith.constant 0 : i32
    return %c0_i32, %c0_i32_0 : i32, i32
  }
  func.func @transform_8(%arg0: i32) -> (i32, i32) {
    %c0_i32 = arith.constant 0 : i32
    %c0_i32_0 = arith.constant 0 : i32
    %c0_i32_1 = arith.constant 0 : i32
    return %c0_i32, %c0_i32_0 : i32, i32
  }
  func.func @transform_9(%arg0: i32) -> (i32, i32, i32) {
    %c0_i32 = arith.constant 0 : i32
    %c0_i32_0 = arith.constant 0 : i32
    %c0_i32_1 = arith.constant 0 : i32
    return %arg0, %c0_i32, %c0_i32_0 : i32, i32, i32
  }
}

</mosaic_0001>

<bundles_post_ra>
// kernel: cpc_forward.1
= control target key start
LH: loop header
LB: loop body
LE: loop exit
PB: predicated region body
PF: predicated region fallthrough
CT: control target
= control target key end

     0   :  { %s2815_s30 = smov 0   ;;  %s4107_s0 = inlined_call_operand.vmem [shape: f32[2,4,256], index: 0, kind: input, shape index: {}]   ;;  %s4108_s1 = inlined_call_operand.vmem [shape: f32[4,4], index: 1, kind: input, shape index: {}]   ;;  %s4109_s2 = inlined_call_operand.vmem [shape: f32[256,16], index: 2, kind: input, shape index: {}]   ;;  %s4110_s3 = inlined_call_operand.vmem [shape: f32[256,16], index: 3, kind: input, shape index: {}]   ;;  %s4111_s4 = inlined_call_operand.vmem [shape: f32[16,256], index: 4, kind: input, shape index: {}]   ;;  %s4112_s5 = inlined_call_operand.vmem [shape: f32[16,256], index: 5, kind: input, shape index: {}]   ;;  %s4113_s6 = inlined_call_operand.vmem [shape: f32[1,4], index: 6, kind: input, shape index: {}]   ;;  %s4114_s7 = inlined_call_operand.vmem [shape: f32[1,16], index: 7, kind: input, shape index: {}]   ;;  %s4115_s8 = inlined_call_operand.vmem [shape: f32[1,16], index: 8, kind: input, shape index: {}]   ;;  %s4116_s9 = inlined_call_operand.vmem [shape: f32[2,4,256], index: 9, kind: output, shape index: {}]  }
   0x1 LB: > { %s2729_s10 = sadd.s32 4294967295, %s2763_s30   ;;  %p2733_p0 = scmp.ge.s32.totalorder %s2763_s30, 1  ;;  %s2763_s30 = sphi %s2815_s30, %s19_s30  }
   0x2   : > { %p287_p1 = scmp.lt.s32.totalorder %s2763_s30, 3 }
   0x4   : > { %p288_p2 = pnand %p2733_p0, %p287_p1 }
   0x6   : > { %291 = sbr.rel (%p288_p2) target bundleno = 682 (0x2aa), region = 56 }
   0xb   : > { %p323_p3 = scmp.lt.s32.totalorder %s2729_s10, 1  ;;  %vm340_vm0 = vcmask 1043456   ;;  %v365_v0 = vld [vmem:[%s4108_s1] sm:$0xf]  ;;  %v555_v1 = vld [vmem:[%s4109_s2 + $0x78] sm:$0xff]  ;;  %v554_v2 = vld [vmem:[%s4109_s2 + $0x70] sm:$0xff] }
   0xc   : > { %v375_v3 = vsel %vm340_vm0, %v365_v0, 0  ;;  %v2833_v4 = vand.u32 4294901760, %v555_v1  ;;  %v2835_v5 = vand.u32 4294901760, %v554_v2  ;;  %v553_v6 = vld [vmem:[%s4109_s2 + $0x68] sm:$0xff]  ;;  %v552_v7 = vld [vmem:[%s4109_s2 + $0x60] sm:$0xff]  ;;  %v551_v8 = vld [vmem:[%s4109_s2 + $0x58] sm:$0xff] }
   0xd   : > { %s4169_s10 = smov (!%p323_p3, %s2729_s10), 1  ;;  %v2848_v9 = vand.u32 4294901760, %v375_v3  ;;  %v2850_v10 = vand.u32 4294901760, %v553_v6  ;;  %v2852_v11 = vand.u32 4294901760, %v552_v7  ;;  %v2854_v12 = vand.u32 4294901760, %v551_v8  ;;  %v550_v33 = vld [vmem:[%s4109_s2 + $0x50] sm:$0xff] }
   0xe   : > { %v2857_v13 = vsub.f32 %v555_v1, %v2833_v4  ;;  %v2860_v14 = vsub.f32 %v554_v2, %v2835_v5  ;;  %s2740_s23 = sshll.u32 %s4169_s10, 3  ;;  %v2913_v39 = vand.u32 4294901760, %v550_v33  ;;  %v549_v42 = vld [vmem:[%s4109_s2 + $0x48] sm:$0xff]  ;;  %v548_v45 = vld [vmem:[%s4109_s2 + $0x40] sm:$0xff]  ;;  %v547_v49 = vld [vmem:[%s4109_s2 + $0x38] sm:$0xff]  ;;  %vm371_vm1 = vcmask 31744  }
   0xf   : > { %v2864_v15 = vsub.f32 %v375_v3, %v2848_v9  ;;  %469 = vmatpush.msra.mxu3 %v2848_v9  ;;  %v2868_v16 = vsub.f32 %v553_v6, %v2850_v10  ;;  %v2871_v17 = vsub.f32 %v552_v7, %v2852_v11  ;;  %v2874_v18 = vsub.f32 %v551_v8, %v2854_v12  ;;  %s327_s26 = scalar_lea.vmem %s4107_s0, %s2740_s23  ;;  %v546_v54 = vld [vmem:[%s4109_s2 + $0x30] sm:$0xff]  ;;  %v545_v61 = vld [vmem:[%s4109_s2 + $0x28] sm:$0xff]  ;;  %v544_v6 = vld [vmem:[%s4109_s2 + $0x20] sm:$0xff]  ;;  %s332_s25 = scalar_lea.vmem %s4116_s9, %s2740_s23 }
  0x10   : > { %v616_v19 = vand.u32 4294901760, %v2857_v13  ;;  %v622_v20 = vand.u32 4294901760, %v2860_v14  ;;  %393 = vmatpush.msra.mxu0 %v2848_v9  ;;  %v333_v21 = vld [vmem:[%s327_s26] sm:$0xff]  ;;  %v2919_v43 = vand.u32 4294901760, %v549_v42  ;;  %v2922_v44 = vsub.f32 %v550_v33, %v2913_v39 }
  0x11   : > { %446 = vmatpush.msra.mxu2 %v2864_v15  ;;  %v628_v22 = vand.u32 4294901760, %v2868_v16  ;;  %v634_v23 = vand.u32 4294901760, %v2871_v17  ;;  %335 = vst [vmem:[#allocation1] ss:$2 sm:$0xff] %v333_v21  ;;  %v640_v26 = vand.u32 4294901760, %v2874_v18  ;;  %v2929_v47 = vand.u32 4294901760, %v548_v45 }
  0x12   : > { %v617_v24 = vsub.f32 %v2857_v13, %v616_v19  ;;  %v623_v25 = vsub.f32 %v2860_v14, %v622_v20  ;;  %v646_v46 = vand.u32 4294901760, %v2922_v44  ;;  %v2932_v48 = vsub.f32 %v549_v42, %v2919_v43 }
  0x13   : > { %574 = vmatpush.msrb.mxu2 %v2833_v4  ;;  %v629_v27 = vsub.f32 %v2868_v16, %v628_v22  ;;  %v635_v30 = vsub.f32 %v2871_v17, %v634_v23  ;;  %v641_v32 = vsub.f32 %v2874_v18, %v640_v26  ;;  %v2942_v52 = vand.u32 4294901760, %v547_v49 }
  0x14   : > { %v618_v28 = vand.u32 4294901760, %v617_v24  ;;  %v624_v29 = vand.u32 4294901760, %v623_v25  ;;  %v647_v50 = vsub.f32 %v2922_v44, %v646_v46  ;;  %v652_v51 = vand.u32 4294901760, %v2932_v48 }
  0x15   : > { %576 = vmatpush.msrb.mxu2 %v2835_v5  ;;  %v630_v31 = vand.u32 4294901760, %v629_v27  ;;  %v636_v34 = vand.u32 4294901760, %v635_v30  ;;  %v642_v40 = vand.u32 4294901760, %v641_v32  ;;  %v2945_v53 = vsub.f32 %v548_v45, %v2929_v47  ;;  %v543_v27 = vld [vmem:[%s4109_s2 + $0x18] sm:$0xff] }
  0x16   : > { %619 = vmatpush.msrb.mxu3 %v618_v28  ;;  %v648_v55 = vand.u32 4294901760, %v647_v50  ;;  %v653_v56 = vsub.f32 %v2932_v48, %v652_v51  ;;  %v420_v57 = vand.u32 4294901760, %v2864_v15  ;;  %v2956_v59 = vand.u32 4294901760, %v546_v54 }
  0x17   : > { %578 = vmatpush.msrb.mxu2 %v2850_v10  ;;  %v658_v58 = vand.u32 4294901760, %v2945_v53  ;;  %v2959_v60 = vsub.f32 %v547_v49, %v2942_v52  ;;  %v2968_v1 = vand.u32 4294901760, %v545_v61  ;;  %vm2008_vm10 = vcmask 130048  }
  0x18   : > { %625 = vmatpush.msrb.mxu3 %v624_v29  ;;  %v336_v35 = vld.sshfl [vmem:[#allocation1] sm:$0xff pattern:$0x75316420]  ;;  %v337_v36 = vld.sshfl [vmem:[#allocation1 + $0x8] sm:$0xff pattern:$0x75316420]  ;;  %v421_v63 = vsub.f32 %v2864_v15, %v420_v57  ;;  %495 = vmatpush.msrb.mxu0 %v420_v57  ;;  %v2973_v3 = vsub.f32 %v546_v54, %v2956_v59 }
  0x19   : > { %580 = vmatpush.msrb.mxu2 %v2852_v11  ;;  %v341_v37 = vsel %vm340_vm0, %v336_v35, 0.0  ;;  %v342_v38 = vsel %vm340_vm0, %v337_v36, 0.0  ;;  %346 = vst [vmem:[#allocation1] ss:$2 sm:$0xff] %v333_v21  ;;  %v654_v62 = vand.u32 4294901760, %v653_v56  ;;  %v659_v0 = vsub.f32 %v2945_v53, %v658_v58  ;;  %v542_v35 = vld [vmem:[%s4109_s2 + $0x10] sm:$0xff] }
  0x1a   : > { %631 = vmatpush.msrb.mxu3 %v630_v31  ;;  %v343_v41 = vadd.f32 %v342_v38, %v341_v37  ;;  %v664_v2 = vand.u32 4294901760, %v2959_v60  ;;  %v422_v7 = vand.u32 4294901760, %v421_v63  ;;  %v2978_v15 = vand.u32 4294901760, %v544_v6  ;;  %v540_v54 = vld [vmem:[%s4109_s2] sm:$0xff] }
  0x1b   : > { %582 = vmatpush.msrb.mxu2 %v2854_v12  ;;  %v660_v8 = vand.u32 4294901760, %v659_v0  ;;  %v2981_v21 = vsub.f32 %v545_v61, %v2968_v1  ;;  %v670_v25 = vand.u32 4294901760, %v2973_v3  ;;  %v2992_v29 = vand.u32 4294901760, %v543_v27 }
  0x1c   : > { %637 = vmatpush.msrb.mxu3 %v636_v34  ;;  %344 = vadd.xlane.f32.xlu0 %v343_v41  ;;  %v665_v24 = vsub.f32 %v2959_v60, %v664_v2  ;;  %v2995_v30 = vsub.f32 %v544_v6, %v2978_v15  ;;  %v3010_v37 = vand.u32 4294901760, %v542_v35  ;;  %v541_v41 = vld [vmem:[%s4109_s2 + $0x8] sm:$0xff]  ;;  %v3036_v57 = vand.u32 4294901760, %v540_v54 }
  0x1d   : > { %584 = vmatpush.msrb.mxu2 %v2913_v39  ;;  %423 = vmatpush.msra.mxu1 %v422_v7  ;;  %v676_v28 = vand.u32 4294901760, %v2981_v21  ;;  %v671_v32 = vsub.f32 %v2973_v3, %v670_v25  ;;  %v3013_v38 = vsub.f32 %v543_v27, %v2992_v29  ;;  %v3023_v45 = vand.u32 4294901760, %v541_v41 }
  0x1e   : > { %643 = vmatpush.msrb.mxu3 %v642_v40  ;;  %v666_v31 = vand.u32 4294901760, %v665_v24  ;;  %v682_v34 = vand.u32 4294901760, %v2995_v30  ;;  %v3026_v49 = vsub.f32 %v542_v35, %v3010_v37  ;;  %v3047_v6 = vsub.f32 %v540_v54, %v3036_v57 }
  0x1f   : > { %586 = vmatpush.msrb.mxu2 %v2919_v43  ;;  %517 = vmatpush.msrb.mxu1 %v2848_v9  ;;  %v677_v33 = vsub.f32 %v2981_v21, %v676_v28  ;;  %v672_v36 = vand.u32 4294901760, %v671_v32  ;;  %v688_v42 = vand.u32 4294901760, %v3013_v38  ;;  %v3039_v61 = vsub.f32 %v541_v41, %v3023_v45 }
  0x20   : > { %649 = vmatpush.msrb.mxu3 %v648_v55  ;;  %v683_v40 = vsub.f32 %v2995_v30, %v682_v34  ;;  %v694_v56 = vand.u32 4294901760, %v3026_v49  ;;  %v706_v24 = vand.u32 4294901760, %v3047_v6  ;;  %v4117_v35 = vlaneseq }
  0x21   : > { %588 = vmatpush.msrb.mxu2 %v2929_v47  ;;  %v678_v9 = vand.u32 4294901760, %v677_v33  ;;  %v689_v55 = vsub.f32 %v3013_v38, %v688_v42  ;;  %v700_v0 = vand.u32 4294901760, %v3039_v61  ;;  %v347_v33 = vld.sshfl [vmem:[#allocation1] sm:$0xff pattern:$0x75316420] }
  0x22   : > { %655 = vmatpush.msrb.mxu3 %v654_v62  ;;  %v684_v50 = vand.u32 4294901760, %v683_v40  ;;  %v695_v63 = vsub.f32 %v3026_v49, %v694_v56 }
  0x23   : > { %590 = vmatpush.msrb.mxu2 %v2942_v52  ;;  %v690_v62 = vand.u32 4294901760, %v689_v55 }
  0x24   : > { %661 = vmatpush.msrb.mxu3 %v660_v8  ;;  %v696_v7 = vand.u32 4294901760, %v695_v63  ;;  %v701_v8 = vsub.f32 %v3039_v61, %v700_v0 }
  0x25   : > { %592 = vmatpush.msrb.mxu2 %v2956_v59 }
  0x26   : > { %667 = vmatpush.msrb.mxu3 %v666_v31  ;;  %v702_v27 = vand.u32 4294901760, %v701_v8  ;;  %v707_v31 = vsub.f32 %v3047_v6, %v706_v24 }
  0x27   : > { %594 = vmatpush.msrb.mxu2 %v2968_v1 }
  0x28   : > { %673 = vmatpush.msrb.mxu3 %v672_v36  ;;  %v708_v32 = vand.u32 4294901760, %v707_v31  ;;  %v351_v36 = vsel %vm340_vm0, %v347_v33, 0.0 }
  0x29   : > { %596 = vmatpush.msrb.mxu2 %v2978_v15  ;;  %v352_v40 = vrot.slane %v351_v36, 4 }
  0x2a   : > { %679 = vmatpush.msrb.mxu3 %v678_v9  ;;  %v369_v9 = vand.u32 127, %v4117_v35  ;;  %v1284_v35 = vld [vmem:[%s4110_s3 + $0x60] sm:$0xff] }
  0x2b   : > { %598 = vmatpush.msrb.mxu2 %v2992_v29  ;;  %v353_v55 = vadd.f32 %v352_v40, %v351_v36 }
  0x2c   : > { %685 = vmatpush.msrb.mxu3 %v684_v50 }
  0x2d   : > { %600 = vmatpush.msrb.mxu2 %v3010_v37 }
  0x2e   : > { %691 = vmatpush.msrb.mxu3 %v690_v62 }
  0x2f   : > { %602 = vmatpush.msrb.mxu2 %v3023_v45 }
  0x30   : > { %697 = vmatpush.msrb.mxu3 %v696_v7  ;;  %v354_v7 = vrot.slane %v353_v55, 2 }
  0x31   : > { %604 = vmatpush.msrb.mxu2 %v3036_v57 }
  0x32   : > { %703 = vmatpush.msrb.mxu3 %v702_v27  ;;  %v355_v31 = vadd.f32 %v354_v7, %v353_v55 }
  0x34   : > { %709 = vmatpush.msrb.mxu3 %v708_v32 }
  0x8f   : > { %v345_v41 = vpop.xlane.xlu0 %344 }
  0x90   : > { %v370_v50 = vperm.slane %v345_v41, %v369_v9 }
  0x92   : > { %v372_v54 = vsel %vm371_vm1, %v370_v50, 0 }
  0x93   : > { %v394_v62 = vand.u32 4294901760, %v372_v54 }
  0x95   : > { %v395_v63 = vsub.f32 %v372_v54, %v394_v62  ;;  %425 = vmatmul.f32.vlgmr.msra.gmra.mxu1 %v394_v62 }
  0x96   : > { %770 = vmatpush.msra.mxu1 %v2833_v4 }
  0x97   : > { %449 = vmatmul.f32.vlgmr.msra.gmra.mxu2 %v395_v63  ;;  %v396_v8 = vand.u32 4294901760, %v395_v63 }
  0x98   : > { %772 = vmatpush.msra.mxu1 %v2835_v5  ;;  %811 = vmatpush.msra.mxu2 %v616_v19  ;;  %v571_v19 = vld [vmem:[%s4109_s2 + $0xf8] sm:$0xff] }
  0x99   : > { %473 = vmatmul.f32.vlgmr.msra.gmra.mxu3 %v396_v8  ;;  %v397_v27 = vsub.f32 %v395_v63, %v396_v8  ;;  %v561_v63 = vld [vmem:[%s4109_s2 + $0xa8] sm:$0xff] }
  0x9a   : > { %774 = vmatpush.msra.mxu1 %v2850_v10  ;;  %815 = vmatpush.msra.mxu2 %v622_v20  ;;  %v356_v20 = vrot.slane %v355_v31, 1 }
  0x9b   : > { %v398_v32 = vand.u32 4294901760, %v397_v27  ;;  %878 = vmatpush.msra.mxu3 %v2833_v4  ;;  %v3082_v4 = vand.u32 4294901760, %v571_v19 }
  0x9c   : > { %776 = vmatpush.msra.mxu1 %v2852_v11  ;;  %819 = vmatpush.msra.mxu2 %v628_v22 }
  0x9d   : > { %399 = vmatmul.f32.vlgmr.msra.gmra.mxu0 %v398_v32  ;;  %519 = vmatmul.f32.vlgmr.msrb.gmra.mxu1 %v394_v62 }
  0x9e   : > { %717 = vmatpush.msra.mxu0 %v2857_v13  ;;  %778 = vmatpush.msra.mxu1 %v2854_v12  ;;  %v570_v13 = vld [vmem:[%s4109_s2 + $0xf0] sm:$0xff] }
  0x9f   : > { %880 = vmatpush.msra.mxu3 %v2835_v5  ;;  %823 = vmatpush.msra.mxu2 %v634_v23  ;;  %v357_v5 = vadd.f32 %v356_v20, %v355_v31  ;;  %v567_v23 = vld [vmem:[%s4109_s2 + $0xd8] sm:$0xff]  ;;  %v560_v31 = vld [vmem:[%s4109_s2 + $0xa0] sm:$0xff] }
  0xa0   : > { %720 = vmatpush.msra.mxu0 %v2860_v14  ;;  %780 = vmatpush.msra.mxu1 %v2913_v39  ;;  %v569_v14 = vld [vmem:[%s4109_s2 + $0xe8] sm:$0xff] }
  0xa1   : > { %882 = vmatpush.msra.mxu3 %v2850_v10  ;;  %827 = vmatpush.msra.mxu2 %v640_v26  ;;  %v3094_v10 = vand.u32 4294901760, %v570_v13 }
  0xa2   : > { %723 = vmatpush.msra.mxu0 %v2868_v16  ;;  %782 = vmatpush.msra.mxu1 %v2919_v43  ;;  %v3101_v16 = vsub.f32 %v571_v19, %v3082_v4 }
  0xa3   : > { %884 = vmatpush.msra.mxu3 %v2852_v11  ;;  %831 = vmatpush.msra.mxu2 %v646_v46  ;;  %v3105_v11 = vand.u32 4294901760, %v357_v5 }
  0xa4   : > { %726 = vmatpush.msra.mxu0 %v2871_v17  ;;  %784 = vmatpush.msra.mxu1 %v2929_v47  ;;  %v3110_v17 = vand.u32 4294901760, %v569_v14  ;;  %v957_v22 = vand.u32 4294901760, %v3101_v16 }
  0xa5   : > { %497 = vmatmul.f32.vlgmr.msrb.gmra.mxu0 %v394_v62  ;;  %886 = vmatpush.msra.mxu3 %v2854_v12  ;;  %v568_v12 = vld [vmem:[%s4109_s2 + $0xe0] sm:$0xff]  ;;  %v3130_v26 = vsub.f32 %v357_v5, %v3105_v11 }
  0xa6   : > { %729 = vmatpush.msra.mxu0 %v2874_v18  ;;  %786 = vmatpush.msra.mxu1 %v2942_v52  ;;  %v3118_v18 = vsub.f32 %v570_v13, %v3094_v10 }
  0xa7   : > { %835 = vmatpush.msra.mxu2 %v652_v51  ;;  %888 = vmatpush.msra.mxu3 %v2913_v39  ;;  %v3132_v39 = vand.u32 4294901760, %v568_v12 }
  0xa8   : > { %732 = vmatpush.msra.mxu0 %v2922_v44  ;;  %788 = vmatpush.msra.mxu1 %v2956_v59  ;;  %v566_v44 = vld [vmem:[%s4109_s2 + $0xd0] sm:$0xff]  ;;  %v963_v46 = vand.u32 4294901760, %v3118_v18 }
  0xa9   : > { %839 = vmatpush.msra.mxu2 %v658_v58  ;;  %890 = vmatpush.msra.mxu3 %v2919_v43  ;;  %v3141_v43 = vsub.f32 %v569_v14, %v3110_v17  ;;  %v3154_v51 = vand.u32 4294901760, %v566_v44  ;;  %v3162_v58 = vand.u32 4294901760, %v3130_v26 }
  0xaa   : > { %735 = vmatpush.msra.mxu0 %v2932_v48  ;;  %790 = vmatpush.msra.mxu1 %v2968_v1  ;;  %v3146_v48 = vand.u32 4294901760, %v567_v23  ;;  %v964_v33 = vsub.f32 %v3118_v18, %v963_v46 }
  0xab   : > { %843 = vmatpush.msra.mxu2 %v664_v2  ;;  %892 = vmatpush.msra.mxu3 %v2929_v47  ;;  %v958_v47 = vsub.f32 %v3101_v16, %v957_v22  ;;  %v3165_v2 = vsub.f32 %v568_v12, %v3132_v39  ;;  %v3191_v9 = vsub.f32 %v566_v44, %v3154_v51  ;;  %v558_v12 = vld [vmem:[%s4109_s2 + $0x90] sm:$0xff] }
  0xac   : > { %738 = vmatpush.msra.mxu0 %v2945_v53  ;;  %792 = vmatpush.msra.mxu1 %v2978_v15  ;;  %v565_v53 = vld [vmem:[%s4109_s2 + $0xc8] sm:$0xff]  ;;  %v3180_v36 = vsub.f32 %v567_v23, %v3146_v48  ;;  %v608_v40 = vsub.f32 %v3130_v26, %v3162_v58  ;;  %v965_v55 = vand.u32 4294901760, %v964_v33 }
  0xad   : > { %847 = vmatpush.msra.mxu2 %v670_v25  ;;  %894 = vmatpush.msra.mxu3 %v2942_v52  ;;  %v969_v52 = vand.u32 4294901760, %v3141_v43  ;;  %v564_v25 = vld [vmem:[%s4109_s2 + $0xc0] sm:$0xff]  ;;  %v975_v41 = vand.u32 4294901760, %v3165_v2 }
  0xae   : > { %741 = vmatpush.msra.mxu0 %v2959_v60  ;;  %794 = vmatpush.msra.mxu1 %v2992_v29  ;;  %v348_v60 = vld.sshfl [vmem:[#allocation1 + $0x8] sm:$0xff pattern:$0x75316420]  ;;  %v3198_v50 = vand.u32 4294901760, %v564_v25  ;;  %v981_v62 = vand.u32 4294901760, %v3180_v36  ;;  %v3226_v7 = vand.u32 4294901760, %v608_v40 }
  0xaf   : > { %851 = vmatpush.msra.mxu2 %v676_v28  ;;  %896 = vmatpush.msra.mxu3 %v2956_v59  ;;  %v3182_v28 = vand.u32 4294901760, %v565_v53  ;;  %v563_v59 = vld [vmem:[%s4109_s2 + $0xb8] sm:$0xff]  ;;  %v358_v54 = vsel %vm340_vm0, %v348_v60, 0.0  ;;  %v976_v8 = vsub.f32 %v3165_v2, %v975_v41 }
  0xb0   : > { %744 = vmatpush.msra.mxu0 %v2973_v3  ;;  %796 = vmatpush.msra.mxu1 %v3010_v37  ;;  %v959_v3 = vand.u32 4294901760, %v958_v47  ;;  %v982_v32 = vsub.f32 %v3180_v36, %v981_v62 }
  0xb1   : > { %855 = vmatpush.msra.mxu2 %v682_v34  ;;  %898 = vmatpush.msra.mxu3 %v2968_v1  ;;  %v970_v1 = vsub.f32 %v3141_v43, %v969_v52  ;;  %v562_v34 = vld [vmem:[%s4109_s2 + $0xb0] sm:$0xff]  ;;  %v977_v13 = vand.u32 4294901760, %v976_v8 }
  0xb2   : > { %747 = vmatpush.msra.mxu0 %v2981_v21  ;;  %798 = vmatpush.msra.mxu1 %v3023_v45  ;;  %v3207_v21 = vand.u32 4294901760, %v563_v59 }
  0xb3   : > { %859 = vmatpush.msra.mxu2 %v688_v42  ;;  %900 = vmatpush.msra.mxu3 %v2978_v15  ;;  %v3216_v42 = vsub.f32 %v565_v53, %v3182_v28  ;;  %v4129_v15 = vand.u32 4294901760, %v3191_v9  ;;  %v971_v27 = vand.u32 4294901760, %v970_v1 }
  0xb4   : > { %750 = vmatpush.msra.mxu0 %v2995_v30  ;;  %800 = vmatpush.msra.mxu1 %v3036_v57  ;;  %v359_v30 = vrot.slane %v358_v54, 4 }
  0xb5   : > { %863 = vmatpush.msra.mxu2 %v694_v56  ;;  %902 = vmatpush.msra.mxu3 %v2992_v29  ;;  %v3232_v56 = vsub.f32 %v564_v25, %v3198_v50  ;;  %v3234_v29 = vand.u32 4294901760, %v562_v34  ;;  %v4127_v19 = vand.u32 4294901760, %v3216_v42 }
  0xb6   : > { %753 = vmatpush.msra.mxu0 %v3013_v38  ;;  %960 = vmatpush.msrb.mxu1 %v959_v3  ;;  %v3240_v38 = vsub.f32 %v563_v59, %v3207_v21  ;;  %v360_v20 = vadd.f32 %v359_v30, %v358_v54  ;;  %v3297_v59 = vand.u32 4294901760, %v558_v12 }
  0xb7   : > { %867 = vmatpush.msra.mxu2 %v700_v0  ;;  %904 = vmatpush.msra.mxu3 %v3010_v37  ;;  %v3250_v0 = vand.u32 4294901760, %v561_v63  ;;  %v988_v37 = vsub.f32 %v3191_v9, %v4129_v15  ;;  %v4126_v5 = vand.u32 4294901760, %v3232_v56  ;;  %v994_v23 = vsub.f32 %v3216_v42, %v4127_v19 }
  0xb8   : > { %756 = vmatpush.msra.mxu0 %v3026_v49  ;;  %966 = vmatpush.msrb.mxu1 %v965_v55  ;;  %v559_v49 = vld [vmem:[%s4109_s2 + $0x98] sm:$0xff]  ;;  %v4125_v14 = vand.u32 4294901760, %v3240_v38  ;;  %v556_v55 = vld [vmem:[%s4109_s2 + $0x80] sm:$0xff] }
  0xb9   : > { %871 = vmatpush.msra.mxu2 %v706_v24  ;;  %906 = vmatpush.msra.mxu3 %v3023_v45  ;;  %v3265_v24 = vsub.f32 %v562_v34, %v3234_v29  ;;  %v3267_v45 = vand.u32 4294901760, %v560_v31  ;;  %v3280_v44 = vsub.f32 %v561_v63, %v3250_v0  ;;  %v3282_v47 = vand.u32 4294901760, %v559_v49 }
  0xba   : > { %759 = vmatpush.msra.mxu0 %v3039_v61  ;;  %610 = vmatmul.f32.vlgmr.msrb.gmra.mxu2 %v3226_v7  ;;  %v983_v61 = vand.u32 4294901760, %v982_v32  ;;  %v989_v53 = vand.u32 4294901760, %v988_v37  ;;  %v1000_v25 = vsub.f32 %v3232_v56, %v4126_v5  ;;  %v1006_v3 = vsub.f32 %v3240_v38, %v4125_v14 }
  0xbb   : > { %972 = vmatpush.msrb.mxu1 %v971_v27  ;;  %1058 = vmatpush.msrb.mxu2 %v3101_v16  ;;  %v4124_v60 = vand.u32 4294901760, %v3265_v24  ;;  %v3295_v33 = vsub.f32 %v560_v31, %v3267_v45  ;;  %v995_v40 = vand.u32 4294901760, %v994_v23  ;;  %v4123_v54 = vand.u32 4294901760, %v3280_v44 }
  0xbc   : > { %762 = vmatpush.msra.mxu0 %v3047_v6  ;;  %908 = vmatpush.msra.mxu3 %v3036_v57  ;;  %v557_v6 = vld [vmem:[%s4109_s2 + $0x88] sm:$0xff]  ;;  %v361_v57 = vrot.slane %v360_v20, 2  ;;  %v3307_v1 = vsub.f32 %v559_v49, %v3282_v47  ;;  %v1001_v30 = vand.u32 4294901760, %v1000_v25  ;;  %v3322_v31 = vsub.f32 %v558_v12, %v3297_v59 }
  0xbd   : > { %711 = vmatmul.f32.vlgmr.msrb.gmra.mxu3 %v3105_v11  ;;  %978 = vmatpush.msrb.mxu1 %v977_v13  ;;  %v3309_v34 = vand.u32 4294901760, %v557_v6  ;;  %v1012_v8 = vsub.f32 %v3265_v24, %v4124_v60  ;;  %v4122_v27 = vand.u32 4294901760, %v3295_v33  ;;  %v1007_v32 = vand.u32 4294901760, %v1006_v3  ;;  %v1281_v60 = vld [vmem:[%s4110_s3 + $0x48] sm:$0xff] }
  0xbe   : > { %915 = vmatpush.msrb.mxu0 %v3082_v4  ;;  %1061 = vmatpush.msrb.mxu2 %v3118_v18  ;;  %v362_v63 = vadd.f32 %v361_v57, %v360_v20  ;;  %v1018_v37 = vsub.f32 %v3280_v44, %v4123_v54  ;;  %v4121_v49 = vand.u32 4294901760, %v3307_v1  ;;  %v3331_v20 = vand.u32 4294901760, %v556_v55 }
  0xbf   : > { %1111 = vmatpush.msrb.mxu3 %v3082_v4  ;;  %984 = vmatpush.msrb.mxu1 %v983_v61  ;;  %v3334_v13 = vsub.f32 %v557_v6, %v3309_v34  ;;  %v1013_v61 = vand.u32 4294901760, %v1012_v8  ;;  %v1024_v23 = vsub.f32 %v3295_v33, %v4122_v27  ;;  %v1282_v27 = vld [vmem:[%s4110_s3 + $0x50] sm:$0xff] }
  0xc0   : > { %917 = vmatpush.msrb.mxu0 %v3094_v10  ;;  %1064 = vmatpush.msrb.mxu2 %v3141_v43  ;;  %v363_v12 = vrot.slane %v362_v63, 1  ;;  %v1019_v6 = vand.u32 4294901760, %v1018_v37  ;;  %v1030_v57 = vsub.f32 %v3307_v1, %v4121_v49  ;;  %v3351_v3 = vsub.f32 %v556_v55, %v3331_v20 }
  0xc1   : > { %1113 = vmatpush.msrb.mxu3 %v3094_v10  ;;  %990 = vmatpush.msrb.mxu1 %v989_v53  ;;  %v4120_v53 = vand.u32 4294901760, %v3322_v31  ;;  %v4119_v25 = vand.u32 4294901760, %v3334_v13  ;;  %v3449_v5 = vand.u32 4294901760, %v1282_v27 }
  0xc2   : > { %919 = vmatpush.msrb.mxu0 %v3110_v17  ;;  %1067 = vmatpush.msrb.mxu2 %v3165_v2  ;;  %v1031_v55 = vand.u32 4294901760, %v1030_v57 }
  0xc3   : > { %1115 = vmatpush.msrb.mxu3 %v3110_v17  ;;  %996 = vmatpush.msrb.mxu1 %v995_v40  ;;  %v364_v40 = vadd.f32 %v363_v12, %v362_v63  ;;  %v1036_v8 = vsub.f32 %v3322_v31, %v4120_v53  ;;  %v1042_v63 = vsub.f32 %v3334_v13, %v4119_v25  ;;  %v1287_v12 = vld [vmem:[%s4110_s3 + $0x78] sm:$0xff] }
  0xc4   : > { %921 = vmatpush.msrb.mxu0 %v3132_v39  ;;  %1070 = vmatpush.msrb.mxu2 %v3180_v36  ;;  %v3380_v57 = vand.u32 4294901760, %v1287_v12  ;;  %v1283_v53 = vld [vmem:[%s4110_s3 + $0x58] sm:$0xff] }
  0xc5   : > { %1117 = vmatpush.msrb.mxu3 %v3132_v39  ;;  %1002 = vmatpush.msrb.mxu1 %v1001_v30  ;;  %v1025_v30 = vand.u32 4294901760, %v1024_v23  ;;  %v3368_v37 = vand.u32 4294901760, %v364_v40  ;;  %v1043_v23 = vand.u32 4294901760, %v1042_v63  ;;  %v3426_v49 = vand.u32 4294901760, %v1283_v53 }
  0xc6   : > { %923 = vmatpush.msrb.mxu0 %v3146_v48  ;;  %1073 = vmatpush.msrb.mxu2 %v3191_v9 }
  0xc7   : > { %1119 = vmatpush.msrb.mxu3 %v3146_v48  ;;  %1008 = vmatpush.msrb.mxu1 %v1007_v32  ;;  %v4118_v32 = vand.u32 4294901760, %v3351_v3 }
  0xc8   : > { %925 = vmatpush.msrb.mxu0 %v3154_v51  ;;  %1076 = vmatpush.msrb.mxu2 %v3216_v42 }
  0xc9   : > { %1121 = vmatpush.msrb.mxu3 %v3154_v51  ;;  %1014 = vmatpush.msrb.mxu1 %v1013_v61  ;;  %v1037_v61 = vand.u32 4294901760, %v1036_v8  ;;  %v3388_v8 = vsub.f32 %v364_v40, %v3368_v37 }
  0xca   : > { %927 = vmatpush.msrb.mxu0 %v3182_v28  ;;  %1079 = vmatpush.msrb.mxu2 %v3232_v56 }
  0xcb   : > { %1123 = vmatpush.msrb.mxu3 %v3182_v28  ;;  %1020 = vmatpush.msrb.mxu1 %v1019_v6  ;;  %v1048_v6 = vsub.f32 %v3351_v3, %v4118_v32  ;;  %v3408_v32 = vand.u32 4294901760, %v3388_v8 }
  0xcc   : > { %929 = vmatpush.msrb.mxu0 %v3198_v50  ;;  %1082 = vmatpush.msrb.mxu2 %v3240_v38 }
  0xcd   : > { %1125 = vmatpush.msrb.mxu3 %v3198_v50  ;;  %1026 = vmatpush.msrb.mxu1 %v1025_v30  ;;  %v1286_v30 = vld [vmem:[%s4110_s3 + $0x70] sm:$0xff]  ;;  %v1049_v40 = vand.u32 4294901760, %v1048_v6  ;;  %4139 = vst [vmem:[#allocation2_spill] sm:$0xff] %v3408_v32  ;;  %v949_v54 = vsub.f32 %v3388_v8, %v3408_v32 }
  0xce   : > { %931 = vmatpush.msrb.mxu0 %v3207_v21  ;;  %1085 = vmatpush.msrb.mxu2 %v3265_v24  ;;  %v3396_v63 = vand.u32 4294901760, %v1286_v30 }
  0xcf   : > { %1127 = vmatpush.msrb.mxu3 %v3207_v21  ;;  %1032 = vmatpush.msrb.mxu1 %v1031_v55  ;;  %v1285_v55 = vld [vmem:[%s4110_s3 + $0x68] sm:$0xff]  ;;  %v3465_v19 = vand.u32 4294901760, %v949_v54  ;;  %v3483_v54 = vsub.f32 %v1282_v27, %v3449_v5 }
  0xd0   : > { %933 = vmatpush.msrb.mxu0 %v3234_v29  ;;  %1088 = vmatpush.msrb.mxu2 %v3280_v44  ;;  %v3410_v25 = vand.u32 4294901760, %v1285_v55 }
  0xd1   : > { %1129 = vmatpush.msrb.mxu3 %v3234_v29  ;;  %1038 = vmatpush.msrb.mxu1 %v1037_v61  ;;  %v3403_v61 = vsub.f32 %v1287_v12, %v3380_v57  ;;  %v3422_v12 = vsub.f32 %v1286_v30, %v3396_v63 }
  0xd2   : > { %935 = vmatpush.msrb.mxu0 %v3250_v0  ;;  %1091 = vmatpush.msrb.mxu2 %v3295_v33  ;;  %v3436_v30 = vsub.f32 %v1285_v55, %v3410_v25  ;;  %v3458_v55 = vsub.f32 %v1283_v53, %v3426_v49 }
  0xd3   : > { %1131 = vmatpush.msrb.mxu3 %v3250_v0  ;;  %873 = vmatmul.f32.vlgmr.msra.gmra.mxu2 %v3105_v11  ;;  %v4128_v6 = vand.u32 4294901760, %v3403_v61  ;;  %v4130_v14 = vand.u32 4294901760, %v3422_v12 }
  0xd4   : > { %937 = vmatpush.msrb.mxu0 %v3267_v45  ;;  %1044 = vmatpush.msrb.mxu1 %v1043_v23  ;;  %v3417_v23 = vand.u32 4294901760, %v1284_v35  ;;  %v4131_v16 = vand.u32 4294901760, %v3436_v30  ;;  %v4133_v15 = vand.u32 4294901760, %v3458_v55 }
  0xd5   : > { %1094 = vmatpush.msrb.mxu2 %v3307_v1  ;;  %1133 = vmatpush.msrb.mxu3 %v3267_v45 }
  0xd6   : > { %939 = vmatpush.msrb.mxu0 %v3282_v47  ;;  %910 = vmatmul.f32.vlgmr.msra.gmra.mxu3 %v3105_v11  ;;  %v1361_v27 = vsub.f32 %v3436_v30, %v4131_v16 }
  0xd7   : > { %765 = vmatmul.f32.vlgmr.msra.gmra.mxu0 %v3130_v26  ;;  %1050 = vmatpush.msrb.mxu1 %v1049_v40  ;;  %v3441_v40 = vsub.f32 %v1284_v35, %v3417_v23  ;;  %v1349_v35 = vsub.f32 %v3403_v61, %v4128_v6  ;;  %v1279_v6 = vld [vmem:[%s4110_s3 + $0x38] sm:$0xff] }
  0xd8   : > { %941 = vmatpush.msrb.mxu0 %v3297_v59  ;;  %1097 = vmatpush.msrb.mxu2 %v3322_v31 }
  0xd9   : > { %1135 = vmatpush.msrb.mxu3 %v3282_v47  ;;  %804 = vmatmul.f32.vlgmr.msra.gmra.mxu1 %v3162_v58  ;;  %v4132_v53 = vand.u32 4294901760, %v3441_v40 }
  0xda   : > { %943 = vmatpush.msrb.mxu0 %v3309_v34  ;;  %1100 = vmatpush.msrb.mxu2 %v3334_v13 }
  0xdb   : > { %1219 = vmatpush.msra.mxu1 %v3082_v4  ;;  %1137 = vmatpush.msrb.mxu3 %v3297_v59  ;;  %v1280_v4 = vld [vmem:[%s4110_s3 + $0x40] sm:$0xff] }
  0xdc   : > { %945 = vmatpush.msrb.mxu0 %v3331_v20  ;;  %1103 = vmatpush.msrb.mxu2 %v3351_v3  ;;  %v3485_v18 = vand.u32 4294901760, %v1280_v4 }
  0xdd   : > { %1221 = vmatpush.msra.mxu1 %v3094_v10  ;;  %1139 = vmatpush.msrb.mxu3 %v3309_v34  ;;  %v1355_v10 = vsub.f32 %v3422_v12, %v4130_v14  ;;  %v1277_v14 = vld [vmem:[%s4110_s3 + $0x28] sm:$0xff] }
  0xde   : > { %1152 = vmatpush.msra.mxu0 %v957_v22  ;;  %v3468_v22 = vand.u32 4294901760, %v1281_v60  ;;  %1106 = vmatmul.f32.vlgmr.msrb.gmra.mxu2 %v3388_v8  ;;  %v3517_v2 = vsub.f32 %v1280_v4, %v3485_v18  ;;  %v1362_v4 = vand.u32 4294901760, %v1361_v27  ;;  %v3535_v36 = vand.u32 4294901760, %v1277_v14 }
  0xdf   : > { %1223 = vmatpush.msra.mxu1 %v3110_v17  ;;  %1306 = vmatpush.msra.mxu2 %v3380_v57  ;;  %v1278_v17 = vld [vmem:[%s4110_s3 + $0x30] sm:$0xff]  ;;  %v4141_v27 = vand.u32 4294901760, %v3483_v54 }
  0xe0   : > { %1156 = vmatpush.msra.mxu0 %v963_v46  ;;  %v1350_v46 = vand.u32 4294901760, %v1349_v35  ;;  %1141 = vmatpush.msrb.mxu3 %v3331_v20  ;;  %v3500_v43 = vsub.f32 %v1281_v60, %v3468_v22  ;;  %v1367_v35 = vsub.f32 %v3441_v40, %v4132_v53  ;;  %v1356_v60 = vand.u32 4294901760, %v1355_v10 }
  0xe1   : > { %951 = vmatmul.f32.vlgmr.msrb.gmra.mxu0 %v3465_v19  ;;  %1145 = vmatmul.f32.vlgmr.msrb.gmra.mxu3 %v3408_v32  ;;  %v1373_v53 = vsub.f32 %v3458_v55, %v4133_v15  ;;  %v1275_v15 = vld [vmem:[%s4110_s3 + $0x18] sm:$0xff] }
  0xe2   : > { %1160 = vmatpush.msra.mxu0 %v969_v52  ;;  %v3502_v52 = vand.u32 4294901760, %v1279_v6  ;;  %1225 = vmatpush.msra.mxu1 %v3132_v39  ;;  %v1276_v39 = vld [vmem:[%s4110_s3 + $0x20] sm:$0xff]  ;;  %v3564_v10 = vand.u32 4294901760, %v1275_v15 }
  0xe3   : > { %1308 = vmatpush.msra.mxu2 %v3396_v63  ;;  %1351 = vmatpush.msra.mxu3 %v1350_v46  ;;  %v1368_v46 = vand.u32 4294901760, %v1367_v35  ;;  %v1374_v35 = vand.u32 4294901760, %v1373_v53 }
  0xe4   : > { %1164 = vmatpush.msra.mxu0 %v975_v41  ;;  %v3519_v41 = vand.u32 4294901760, %v1278_v17  ;;  %1052 = vmatmul.f32.vlgmr.msrb.gmra.mxu1 %v3368_v37  ;;  %v3533_v16 = vsub.f32 %v1279_v6, %v3502_v52  ;;  %v1379_v6 = vsub.f32 %v3483_v54, %v4141_v27 }
  0xe5   : > { %1310 = vmatpush.msra.mxu2 %v3410_v25  ;;  %1227 = vmatpush.msra.mxu1 %v3146_v48  ;;  %v4142_v48 = vand.u32 4294901760, %v3216_v42  ;;  %v1274_v42 = vld [vmem:[%s4110_s3 + $0x10] sm:$0xff] }
  0xe6   : > { %1168 = vmatpush.msra.mxu0 %v981_v62  ;;  %v4140_v62 = vand.u32 4294901760, %v3191_v9  ;;  %1357 = vmatpush.msra.mxu3 %v1356_v60  ;;  %v3549_v32 = vsub.f32 %v1278_v17, %v3519_v41  ;;  %v3551_v9 = vand.u32 4294901760, %v1276_v39  ;;  %v4143_v60 = vand.u32 4294901760, %v3500_v43 }
  0xe7   : > { %1312 = vmatpush.msra.mxu2 %v3417_v23  ;;  %1229 = vmatpush.msra.mxu1 %v3154_v51  ;;  %v4135_v27 = vand.u32 4294901760, %v3533_v16  ;;  %v3562_v17 = vsub.f32 %v1277_v14, %v3535_v36  ;;  %v4144_v51 = vand.u32 4294901760, %v3232_v56  ;;  %v1380_v53 = vand.u32 4294901760, %v1379_v6  ;;  %v1273_v56 = vld [vmem:[%s4110_s3 + $0x8] sm:$0xff] }
  0xe8   : > { %1172 = vmatpush.msra.mxu0 %v4140_v62  ;;  %1363 = vmatpush.msra.mxu3 %v1362_v4  ;;  %v1385_v62 = vsub.f32 %v3500_v43, %v4143_v60  ;;  %v4145_v4 = vand.u32 4294901760, %v3517_v2  ;;  %v3578_v60 = vsub.f32 %v1276_v39, %v3551_v9 }
  0xe9   : > { %1314 = vmatpush.msra.mxu2 %v3426_v49  ;;  %1231 = vmatpush.msra.mxu1 %v3182_v28  ;;  %v3586_v28 = vand.u32 4294901760, %v1274_v42  ;;  %v1397_v39 = vsub.f32 %v3533_v16, %v4135_v27  ;;  %v1408_v6 = vand.u32 4294901760, %v3562_v17  ;;  %v4148_v27 = vand.u32 4294901760, %v3280_v44 }
  0xea   : > { %1176 = vmatpush.msra.mxu0 %v4142_v48  ;;  %1369 = vmatpush.msra.mxu3 %v1368_v46  ;;  %v1391_v14 = vsub.f32 %v3517_v2, %v4145_v4  ;;  %v1402_v48 = vand.u32 4294901760, %v3549_v32  ;;  %v1386_v46 = vand.u32 4294901760, %v1385_v62  ;;  %v3594_v4 = vsub.f32 %v1275_v15, %v3564_v10 }
  0xeb   : > { %1316 = vmatpush.msra.mxu2 %v3449_v5  ;;  %1233 = vmatpush.msra.mxu1 %v3198_v50  ;;  %v4147_v50 = vand.u32 4294901760, %v3265_v24  ;;  %v3613_v24 = vsub.f32 %v1274_v42, %v3586_v28  ;;  %v4149_v44 = vand.u32 4294901760, %v3295_v33 }
  0xec   : > { %1180 = vmatpush.msra.mxu0 %v4144_v51  ;;  %v4146_v51 = vand.u32 4294901760, %v3240_v38  ;;  %1375 = vmatpush.msra.mxu3 %v1374_v35  ;;  %v1272_v38 = vld [vmem:[%s4110_s3] sm:$0xff]  ;;  %v3602_v35 = vand.u32 4294901760, %v1273_v56  ;;  %v1392_v62 = vand.u32 4294901760, %v1391_v14  ;;  %v1403_v15 = vsub.f32 %v3549_v32, %v1402_v48 }
  0xed   : > { %1318 = vmatpush.msra.mxu2 %v3468_v22  ;;  %1235 = vmatpush.msra.mxu1 %v3207_v21  ;;  %v3615_v21 = vand.u32 4294901760, %v1272_v38  ;;  %v1409_v14 = vsub.f32 %v3562_v17, %v1408_v6  ;;  %v1426_v33 = vand.u32 4294901760, %v3613_v24 }
  0xee   : > { %1184 = vmatpush.msra.mxu0 %v4146_v51  ;;  %1381 = vmatpush.msra.mxu3 %v1380_v53  ;;  %v1414_v51 = vand.u32 4294901760, %v3578_v60  ;;  %v1398_v53 = vand.u32 4294901760, %v1397_v39 }
  0xef   : > { %1320 = vmatpush.msra.mxu2 %v3485_v18  ;;  %1237 = vmatpush.msra.mxu1 %v3234_v29  ;;  %v3626_v29 = vsub.f32 %v1273_v56, %v3602_v35  ;;  %v1410_v56 = vand.u32 4294901760, %v1409_v14 }
  0xf0   : > { %1188 = vmatpush.msra.mxu0 %v4147_v50  ;;  %1387 = vmatpush.msra.mxu3 %v1386_v46  ;;  %v1420_v50 = vand.u32 4294901760, %v3594_v4  ;;  %v1415_v42 = vsub.f32 %v3578_v60, %v1414_v51  ;;  %v4150_v46 = vand.u32 4294901760, %v3307_v1 }
  0xf1   : > { %1322 = vmatpush.msra.mxu2 %v3502_v52  ;;  %1239 = vmatpush.msra.mxu1 %v3250_v0  ;;  %v3637_v0 = vsub.f32 %v1272_v38, %v3615_v21  ;;  %v4152_v38 = vand.u32 4294901760, %v3334_v13 }
  0xf2   : > { %1192 = vmatpush.msra.mxu0 %v4148_v27  ;;  %1393 = vmatpush.msra.mxu3 %v1392_v62  ;;  %v1404_v27 = vand.u32 4294901760, %v1403_v15  ;;  %v1421_v39 = vsub.f32 %v3594_v4, %v1420_v50  ;;  %v4151_v62 = vand.u32 4294901760, %v3322_v31  ;;  %v1416_v1 = vand.u32 4294901760, %v1415_v42 }
  0xf3   : > { %1324 = vmatpush.msra.mxu2 %v3519_v41  ;;  %1241 = vmatpush.msra.mxu1 %v3267_v45  ;;  %v1432_v45 = vand.u32 4294901760, %v3626_v29  ;;  %v1427_v15 = vsub.f32 %v3613_v24, %v1426_v33  ;;  %v1438_v31 = vand.u32 4294901760, %v3637_v0 }
  0xf4   : > { %1196 = vmatpush.msra.mxu0 %v4149_v44  ;;  %1399 = vmatpush.msra.mxu3 %v1398_v53  ;;  %v4153_v53 = vand.u32 4294901760, %v3351_v3  ;;  %v4154_v3 = vand.u32 4294901760, %v3403_v61  ;;  %v4155_v44 = vand.u32 4294901760, %v3422_v12 }
  0xf5   : > { %1326 = vmatpush.msra.mxu2 %v3535_v36  ;;  %1243 = vmatpush.msra.mxu1 %v3282_v47  ;;  %v1422_v47 = vand.u32 4294901760, %v1421_v39  ;;  %v1433_v13 = vsub.f32 %v3626_v29, %v1432_v45  ;;  %v1439_v14 = vsub.f32 %v3637_v0, %v1438_v31 }
  0xf6   : > { %1200 = vmatpush.msra.mxu0 %v4150_v46  ;;  %1405 = vmatpush.msra.mxu3 %v1404_v27  ;;  %v4156_v27 = vand.u32 4294901760, %v3436_v30 }
  0xf7   : > { %1328 = vmatpush.msra.mxu2 %v3551_v9  ;;  %1245 = vmatpush.msra.mxu1 %v3297_v59  ;;  %v1428_v59 = vand.u32 4294901760, %v1427_v15  ;;  %v1297_v15 = vld [vmem:[%s4110_s3 + $0xc8] sm:$0xff] }
  0xf8   : > { %1204 = vmatpush.msra.mxu0 %v4151_v62  ;;  %1411 = vmatpush.msra.mxu3 %v1410_v56  ;;  %v1299_v56 = vld [vmem:[%s4110_s3 + $0xd8] sm:$0xff] }
  0xf9   : > { %1330 = vmatpush.msra.mxu2 %v3564_v10  ;;  %1247 = vmatpush.msra.mxu1 %v3309_v34  ;;  %v1434_v34 = vand.u32 4294901760, %v1433_v13 }
  0xfa   : > { %1208 = vmatpush.msra.mxu0 %v4152_v38  ;;  %1417 = vmatpush.msra.mxu3 %v1416_v1 }
  0xfb   : > { %1249 = vmatpush.msra.mxu1 %v3331_v20  ;;  %1332 = vmatpush.msra.mxu2 %v3586_v28  ;;  %v1440_v20 = vand.u32 4294901760, %v1439_v14 }
  0xfc   : > { %1212 = vmatpush.msra.mxu0 %v4153_v53  ;;  %1423 = vmatpush.msra.mxu3 %v1422_v47  ;;  %v366_v47 = vld [vmem:[%s4113_s6] sm:$0x1]  ;;  %v1295_v53 = vld [vmem:[%s4110_s3 + $0xb8] sm:$0xff] }
  0xfd   : > { %1214 = vmatmul.f32.vlgmr.msra.gmra.mxu0 %v3368_v37  ;;  %1251 = vmatmul.f32.vlgmr.msra.gmra.mxu1 %v3368_v37 }
  0xfe   : > { %1449 = vmatpush.msrb.mxu0 %v3403_v61  ;;  %1502 = vmatpush.msrb.mxu1 %v3380_v57  ;;  %v1303_v61 = vld [vmem:[%s4110_s3 + $0xf8] sm:$0xff] }
  0xff   : > { %1334 = vmatpush.msra.mxu2 %v3602_v35  ;;  %1429 = vmatpush.msra.mxu3 %v1428_v59 }
 0x100   : > { %1452 = vmatpush.msrb.mxu0 %v3422_v12  ;;  %1504 = vmatpush.msrb.mxu1 %v3396_v63  ;;  %v4157_v12 = vand.u32 4294901760, %v3441_v40 }
 0x101   : > { %1336 = vmatpush.msra.mxu2 %v3615_v21  ;;  %1435 = vmatpush.msra.mxu3 %v1434_v34 }
 0x102   : > { %1455 = vmatpush.msrb.mxu0 %v3436_v30  ;;  %1506 = vmatpush.msrb.mxu1 %v3410_v25  ;;  %v3705_v30 = vand.u32 4294901760, %v1303_v61 }
 0x103   : > { %1543 = vmatpush.msrb.mxu2 %v4154_v3  ;;  %1441 = vmatpush.msra.mxu3 %v1440_v20 }
 0x104   : > { %1458 = vmatpush.msrb.mxu0 %v3441_v40  ;;  %1508 = vmatpush.msrb.mxu1 %v3417_v23  ;;  %v4159_v40 = vand.u32 4294901760, %v3483_v54 }
 0x105   : > { %1547 = vmatpush.msrb.mxu2 %v4155_v44  ;;  %1610 = vmatpush.msrb.mxu3 %v3380_v57  ;;  %v1302_v57 = vld [vmem:[%s4110_s3 + $0xf0] sm:$0xff]  ;;  %v3816_v44 = vand.u32 4294901760, %v1295_v53 }
 0x106   : > { %1461 = vmatpush.msrb.mxu0 %v3458_v55  ;;  %1510 = vmatpush.msrb.mxu1 %v3426_v49  ;;  %v3715_v42 = vand.u32 4294901760, %v1302_v57 }
 0x107   : > { %1551 = vmatpush.msrb.mxu2 %v4156_v27  ;;  %1612 = vmatpush.msrb.mxu3 %v3396_v63  ;;  %v4158_v63 = vand.u32 4294901760, %v3458_v55  ;;  %v3723_v55 = vsub.f32 %v1303_v61, %v3705_v30 }
 0x108   : > { %1464 = vmatpush.msrb.mxu0 %v3483_v54  ;;  %1512 = vmatpush.msrb.mxu1 %v3449_v5  ;;  %v1300_v54 = vld [vmem:[%s4110_s3 + $0xe0] sm:$0xff] }
 0x109   : > { %1555 = vmatpush.msrb.mxu2 %v4157_v12  ;;  %1614 = vmatpush.msrb.mxu3 %v3410_v25  ;;  %v1301_v25 = vld [vmem:[%s4110_s3 + $0xe8] sm:$0xff]  ;;  %v3743_v39 = vand.u32 4294901760, %v1300_v54  ;;  %v1689_v62 = vand.u32 4294901760, %v3723_v55 }
 0x10a   : > { %1467 = vmatpush.msrb.mxu0 %v3500_v43  ;;  %1514 = vmatpush.msrb.mxu1 %v3468_v22  ;;  %v3725_v46 = vand.u32 4294901760, %v1301_v25 }
 0x10b   : > { %1559 = vmatpush.msrb.mxu2 %v4158_v63  ;;  %1616 = vmatpush.msrb.mxu3 %v3417_v23  ;;  %v4160_v23 = vand.u32 4294901760, %v3500_v43  ;;  %v3736_v43 = vsub.f32 %v1302_v57, %v3715_v42 }
 0x10c   : > { %1470 = vmatpush.msrb.mxu0 %v3517_v2  ;;  %1516 = vmatpush.msrb.mxu1 %v3485_v18  ;;  %v3753_v1 = vsub.f32 %v1301_v25, %v3725_v46 }
 0x10d   : > { %1563 = vmatpush.msrb.mxu2 %v4159_v40  ;;  %1618 = vmatpush.msrb.mxu3 %v3426_v49  ;;  %v4161_v49 = vand.u32 4294901760, %v3517_v2  ;;  %v4162_v2 = vand.u32 4294901760, %v3533_v16  ;;  %v1695_v38 = vand.u32 4294901760, %v3736_v43 }
 0x10e   : > { %1473 = vmatpush.msrb.mxu0 %v3533_v16  ;;  %1518 = vmatpush.msrb.mxu1 %v3502_v52 }
 0x10f   : > { %1567 = vmatpush.msrb.mxu2 %v4160_v23  ;;  %1620 = vmatpush.msrb.mxu3 %v3449_v5  ;;  %v1298_v5 = vld [vmem:[%s4110_s3 + $0xd0] sm:$0xff]  ;;  %v3847_v23 = vsub.f32 %v1295_v53, %v3816_v44 }
 0x110   : > { %1476 = vmatpush.msrb.mxu0 %v3549_v32  ;;  %1520 = vmatpush.msrb.mxu1 %v3519_v41  ;;  %v3763_v16 = vand.u32 4294901760, %v1298_v5  ;;  %v1690_v32 = vsub.f32 %v3723_v55, %v1689_v62 }
 0x111   : > { %1571 = vmatpush.msrb.mxu2 %v4161_v49  ;;  %1622 = vmatpush.msrb.mxu3 %v3468_v22  ;;  %v3757_v22 = vand.u32 4294901760, %v1299_v56 }
 0x112   : > { %1479 = vmatpush.msrb.mxu0 %v3562_v17  ;;  %1522 = vmatpush.msrb.mxu1 %v3535_v36  ;;  %v3803_v13 = vsub.f32 %v1298_v5, %v3763_v16  ;;  %v426_v59 = vpop.f32.mrf.mxu1 }
 0x113   : > { %1575 = vmatpush.msrb.mxu2 %v4162_v2  ;;  %1624 = vmatpush.msrb.mxu3 %v3485_v18  ;;  %v3771_v18 = vsub.f32 %v1300_v54, %v3743_v39  ;;  %v3789_v17 = vsub.f32 %v1299_v56, %v3757_v22 }
 0x114   : > { %1482 = vmatpush.msrb.mxu0 %v3578_v60  ;;  %1524 = vmatpush.msrb.mxu1 %v3551_v9  ;;  %v1719_v12 = vand.u32 4294901760, %v3803_v13 }
 0x115   : > { %1579 = vmatpush.msrb.mxu2 %v1402_v48  ;;  %1626 = vmatpush.msrb.mxu3 %v3502_v52  ;;  %v1701_v48 = vand.u32 4294901760, %v3753_v1  ;;  %v1296_v52 = vld [vmem:[%s4110_s3 + $0xc0] sm:$0xff]  ;;  %v1707_v34 = vand.u32 4294901760, %v3771_v18  ;;  %v1713_v27 = vand.u32 4294901760, %v3789_v17 }
 0x116   : > { %1485 = vmatpush.msrb.mxu0 %v3594_v4  ;;  %1526 = vmatpush.msrb.mxu1 %v3564_v10  ;;  %v3808_v20 = vand.u32 4294901760, %v1296_v52  ;;  %v1720_v5 = vsub.f32 %v3803_v13, %v1719_v12 }
 0x117   : > { %1583 = vmatpush.msrb.mxu2 %v1408_v6  ;;  %1628 = vmatpush.msrb.mxu3 %v3519_v41  ;;  %v3791_v6 = vand.u32 4294901760, %v1297_v15  ;;  %v1696_v41 = vsub.f32 %v3736_v43, %v1695_v38  ;;  %v1702_v3 = vsub.f32 %v3753_v1, %v1701_v48  ;;  %v1708_v63 = vsub.f32 %v3771_v18, %v1707_v34 }
 0x118   : > { %1488 = vmatpush.msrb.mxu0 %v3613_v24  ;;  %1528 = vmatpush.msrb.mxu1 %v3586_v28  ;;  %v3840_v25 = vsub.f32 %v1296_v52, %v3808_v20  ;;  %v1714_v49 = vsub.f32 %v3789_v17, %v1713_v27 }
 0x119   : > { %1587 = vmatpush.msrb.mxu2 %v1414_v51  ;;  %1630 = vmatpush.msrb.mxu3 %v3535_v36  ;;  %v1691_v51 = vand.u32 4294901760, %v1690_v32  ;;  %v1294_v36 = vld [vmem:[%s4110_s3 + $0xb0] sm:$0xff]  ;;  %v3825_v4 = vsub.f32 %v1297_v15, %v3791_v6  ;;  %v1697_v61 = vand.u32 4294901760, %v1696_v41  ;;  %v1703_v40 = vand.u32 4294901760, %v1702_v3 }
 0x11a   : > { %1491 = vmatpush.msrb.mxu0 %v3626_v29  ;;  %v400_v14 = vpop.f32.mrf.mxu0  ;;  %1530 = vmatpush.msrb.mxu1 %v3602_v35  ;;  %v450_v57 = vpop.f32.mrf.mxu2  ;;  %v3842_v24 = vand.u32 4294901760, %v1294_v36  ;;  %v1709_v2 = vand.u32 4294901760, %v1708_v63  ;;  %v1731_v32 = vand.u32 4294901760, %v3840_v25  ;;  %v1715_v53 = vand.u32 4294901760, %v1714_v49  ;;  %v1288_v49 = vld [vmem:[%s4110_s3 + $0x80] sm:$0xff] }
 0x11b   : > { %1591 = vmatpush.msrb.mxu2 %v1420_v50  ;;  %v401_v60 = vadd.f32 %v400_v14, %v366_v47  ;;  %1632 = vmatpush.msrb.mxu3 %v3551_v9  ;;  %v1293_v9 = vld [vmem:[%s4110_s3 + $0xa8] sm:$0xff]  ;;  %v1725_v29 = vand.u32 4294901760, %v3825_v4  ;;  %v1737_v47 = vand.u32 4294901760, %v3847_v23 }
 0x11c   : > { %1494 = vmatpush.msrb.mxu0 %v3637_v0  ;;  %1532 = vmatpush.msrb.mxu1 %v3615_v21  ;;  %v474_v54 = vpop.f32.mrf.mxu3  ;;  %v3872_v52 = vsub.f32 %v1294_v36, %v3842_v24  ;;  %v1732_v3 = vsub.f32 %v3840_v25, %v1731_v32 }
 0x11d   : > { %v427_v50 = vadd.f32 %v426_v59, %v401_v60  ;;  %1595 = vmatpush.msrb.mxu2 %v1426_v33  ;;  %1634 = vmatpush.msrb.mxu3 %v3564_v10  ;;  %v1292_v10 = vld [vmem:[%s4110_s3 + $0xa0] sm:$0xff]  ;;  %v1726_v41 = vsub.f32 %v3825_v4, %v1725_v29 }
 0x11e   : > { %1647 = vmatpush.msra.mxu0 %v3705_v30  ;;  %1692 = vmatpush.msra.mxu1 %v1691_v51  ;;  %v3874_v0 = vand.u32 4294901760, %v1292_v10  ;;  %v1721_v51 = vand.u32 4294901760, %v1720_v5  ;;  %v1743_v36 = vand.u32 4294901760, %v3872_v52 }
 0x11f   : > { %v451_v33 = vadd.f32 %v450_v57, %v427_v50  ;;  %1599 = vmatpush.msrb.mxu2 %v1432_v45  ;;  %1636 = vmatpush.msrb.mxu3 %v3586_v28  ;;  %v3858_v45 = vand.u32 4294901760, %v1293_v9  ;;  %v1291_v28 = vld [vmem:[%s4110_s3 + $0x98] sm:$0xff]  ;;  %v1738_v57 = vsub.f32 %v3847_v23, %v1737_v47  ;;  %v1727_v63 = vand.u32 4294901760, %v1726_v41 }
 0x120   : > { %1649 = vmatpush.msra.mxu0 %v3715_v42  ;;  %1698 = vmatpush.msra.mxu1 %v1697_v61  ;;  %v3889_v14 = vand.u32 4294901760, %v1291_v28  ;;  %v3904_v50 = vsub.f32 %v1292_v10, %v3874_v0  ;;  %v1744_v5 = vsub.f32 %v3872_v52, %v1743_v36 }
 0x121   : > { %v475_v56 = vadd.f32 %v474_v54, %v451_v33  ;;  %1603 = vmatpush.msrb.mxu2 %v1438_v31  ;;  %1638 = vmatpush.msrb.mxu3 %v3602_v35  ;;  %v1290_v35 = vld [vmem:[%s4110_s3 + $0x90] sm:$0xff]  ;;  %v3887_v59 = vsub.f32 %v1293_v9, %v3858_v45 }
 0x122   : > { %1651 = vmatpush.msra.mxu0 %v3725_v46  ;;  %1342 = vmatmul.f32.vlgmr.msra.gmra.mxu2 %v3226_v7  ;;  %v498_v15 = vpop.f32.mrf.mxu0  ;;  %v520_v7 = vpop.f32.mrf.mxu1  ;;  %v3906_v61 = vand.u32 4294901760, %v1290_v35  ;;  %v1745_v41 = vand.u32 4294901760, %v1744_v5 }
 0x123   : > { %1704 = vmatpush.msra.mxu1 %v1703_v40  ;;  %v499_v31 = vadd.f32 %v498_v15, %v475_v56  ;;  %1790 = vmatpush.msra.mxu2 %v3723_v55  ;;  %v1749_v33 = vand.u32 4294901760, %v3887_v59  ;;  %v3917_v40 = vsub.f32 %v1291_v28, %v3889_v14  ;;  %v1733_v56 = vand.u32 4294901760, %v1732_v3 }
 0x124   : > { %1653 = vmatpush.msra.mxu0 %v3743_v39  ;;  %1640 = vmatpush.msrb.mxu3 %v3615_v21  ;;  %v1289_v21 = vld [vmem:[%s4110_s3 + $0x88] sm:$0xff]  ;;  %v4138_v28 = vand.u32 4294901760, %v3904_v50  ;;  %v1739_v15 = vand.u32 4294901760, %v1738_v57  ;;  %v4165_v55 = vand.u32 4294901760, %v3904_v50 }
 0x125   : > { %1443 = vmatmul.f32.vlgmr.msra.gmra.mxu3 %v3105_v11  ;;  %v3893_v60 = vadd.f32 %v520_v7, %v499_v31  ;;  %1710 = vmatpush.msra.mxu1 %v1709_v2  ;;  %v3919_v10 = vand.u32 4294901760, %v1289_v21  ;;  %v3934_v2 = vsub.f32 %v1290_v35, %v3906_v61  ;;  %v1750_v31 = vsub.f32 %v3887_v59, %v1749_v33 }
 0x126   : > { %1655 = vmatpush.msra.mxu0 %v3757_v22  ;;  %1793 = vmatpush.msra.mxu2 %v3736_v43  ;;  %v4136_v7 = vand.u32 4294901760, %v3917_v40 }
 0x127   : > { %1843 = vmatpush.msra.mxu3 %v3705_v30  ;;  %v523_v9 = vand.u32 2147483647, %v3893_v60  ;;  %1716 = vmatpush.msra.mxu1 %v1715_v53  ;;  %v3944_v53 = vand.u32 4294901760, %v1288_v49  ;;  %v3947_v35 = vsub.f32 %v1289_v21, %v3919_v10  ;;  %v4137_v3 = vand.u32 4294901760, %v3934_v2 }
 0x128   : > { %1657 = vmatpush.msra.mxu0 %v3763_v16  ;;  %1796 = vmatpush.msra.mxu2 %v3753_v1  ;;  %v1751_v21 = vand.u32 4294901760, %v1750_v31 }
 0x129   : > { %v3921_v54 = vadd.f32 1.0, %v523_v9  ;;  %1845 = vmatpush.msra.mxu3 %v3715_v42  ;;  %1722 = vmatpush.msra.mxu1 %v1721_v51  ;;  %v1756_v51 = vsub.f32 %v3904_v50, %v4138_v28  ;;  %v1762_v9 = vsub.f32 %v3917_v40, %v4136_v7  ;;  %v1773_v57 = vand.u32 4294901760, %v3947_v35 }
 0x12a   : > { %1659 = vmatpush.msra.mxu0 %v3791_v6  ;;  %1799 = vmatpush.msra.mxu2 %v3771_v18 }
 0x12b   : > { %2751 = vrcp.f32 %v3921_v54  ;;  %1847 = vmatpush.msra.mxu3 %v3725_v46  ;;  %1728 = vmatpush.msra.mxu1 %v1727_v63  ;;  %v3964_v63 = vsub.f32 %v1288_v49, %v3944_v53  ;;  %v1757_v5 = vand.u32 4294901760, %v1756_v51  ;;  %v1763_v49 = vand.u32 4294901760, %v1762_v9 }
 0x12c   : > { %1661 = vmatpush.msra.mxu0 %v3808_v20  ;;  %1802 = vmatpush.msra.mxu2 %v3789_v17  ;;  %vm530_vm3 = vweird.f32 %v3921_v54 }
 0x12d   : > { %1849 = vmatpush.msra.mxu3 %v3743_v39  ;;  %1734 = vmatpush.msra.mxu1 %v1733_v56  ;;  %v1779_v51 = vand.u32 4294901760, %v3964_v63 }
 0x12e   : > { %1663 = vmatpush.msra.mxu0 %v3816_v44  ;;  %1805 = vmatpush.msra.mxu2 %v3803_v13 }
 0x12f   : > { %1851 = vmatpush.msra.mxu3 %v3757_v22  ;;  %1740 = vmatpush.msra.mxu1 %v1739_v15  ;;  %v1768_v15 = vsub.f32 %v3934_v2, %v4137_v3  ;;  %v1780_v9 = vsub.f32 %v3964_v63, %v1779_v51 }
 0x130   : > { %1665 = vmatpush.msra.mxu0 %v3842_v24  ;;  %1808 = vmatpush.msra.mxu2 %v3825_v4 }
 0x131   : > { %v2752_v56 = vpop.eup %2751  ;;  %1853 = vmatpush.msra.mxu3 %v3763_v16  ;;  %1746 = vmatpush.msra.mxu1 %v1745_v41  ;;  %v1774_v41 = vsub.f32 %v3947_v35, %v1773_v57  ;;  %v1769_v3 = vand.u32 4294901760, %v1768_v15 }
 0x132   : > { %1667 = vmatpush.msra.mxu0 %v3858_v45  ;;  %1811 = vmatpush.msra.mxu2 %v3840_v25  ;;  %v526_v31 = vmul.f32 %v2752_v56, %v3921_v54  ;;  %vm531_vm2 = vweird.f32 %v2752_v56 }
 0x133   : > { %1855 = vmatpush.msra.mxu3 %v3791_v6  ;;  %1752 = vmatpush.msra.mxu1 %v1751_v21  ;;  %v1775_v21 = vand.u32 4294901760, %v1774_v41  ;;  %vm532_vm4 = vmor %vm530_vm3, %vm531_vm2 }
 0x134   : > { %1669 = vmatpush.msra.mxu0 %v3874_v0  ;;  %1814 = vmatpush.msra.mxu2 %v3847_v23  ;;  %v527_v7 = vsub.f32 1.0, %v526_v31 }
 0x135   : > { %1857 = vmatpush.msra.mxu3 %v3808_v20  ;;  %1758 = vmatpush.msra.mxu1 %v1757_v5  ;;  %v4163_v5 = vlaneseq }
 0x136   : > { %1671 = vmatpush.msra.mxu0 %v3889_v14  ;;  %1817 = vmatpush.msra.mxu2 %v3872_v52  ;;  %v528_v28 = vmul.f32 %v2752_v56, %v527_v7  ;;  %v536_v7 = vand.u32 2147483648, %v3921_v54 }
 0x137   : > { %1859 = vmatpush.msra.mxu3 %v3816_v44  ;;  %1764 = vmatpush.msra.mxu1 %v1763_v49  ;;  %v2659_v15 = vshrl.u32 %v4163_v5, 7  ;;  %v534_v49 = vand.u32 2147483647, %v3921_v54 }
 0x138   : > { %1673 = vmatpush.msra.mxu0 %v3906_v61  ;;  %1820 = vmatpush.msra.mxu2 %v3887_v59  ;;  %v529_v31 = vadd.f32 %v2752_v56, %v528_v28  ;;  %v1781_v28 = vand.u32 4294901760, %v1780_v9 }
 0x139   : > { %1861 = vmatpush.msra.mxu3 %v3842_v24  ;;  %1770 = vmatpush.msra.mxu1 %v1769_v3  ;;  %v537_v3 = vor.u32 1.1754944e-38, %v536_v7  ;;  %vm535_vm5 = vcmp.eq.f32.partialorder %v534_v49, 8.507059e+37 }
 0x13a   : > { %1675 = vmatpush.msra.mxu0 %v3919_v10  ;;  %1823 = vmatpush.msra.mxu2 %v3904_v50  ;;  %v533_v41 = vsel %vm532_vm4, %v2752_v56, %v529_v31 }
 0x13b   : > { %1863 = vmatpush.msra.mxu3 %v3858_v45  ;;  %1605 = vmatmul.f32.vlgmr.msrb.gmra.mxu2 %v3105_v11  ;;  %v538_v54 = vsel %vm535_vm5, %v537_v3, %v533_v41 }
 0x13c   : > { %1677 = vmatpush.msra.mxu0 %v3944_v53  ;;  %1776 = vmatpush.msra.mxu1 %v1775_v21 }
 0x13d   : > { %1826 = vmatpush.msra.mxu2 %v3917_v40  ;;  %1865 = vmatpush.msra.mxu3 %v3874_v0 }
 0x13e   : > { %2750 = vset.pattern.permute.xlu0 %v2659_v15  ;;  %1497 = vmatmul.f32.vlgmr.msrb.gmra.mxu0 %v3130_v26  ;;  %v539_v26 = vmul.f32 %v538_v54, %v3893_v60 }
 0x13f   : > { %1642 = vmatmul.f32.vlgmr.msrb.gmra.mxu3 %v3105_v11  ;;  %1884 = vmatpush.msrb.mxu0 %v1689_v62  ;;  %v4167_v62 = vand.u32 4294901760, %v3934_v2 }
 0x140   : > { %1782 = vmatpush.msra.mxu1 %v1781_v28  ;;  %1829 = vmatpush.msra.mxu2 %v3934_v2  ;;  %v2657_v11 = vperm.slane %v539_v26, 0 }
 0x141   : > { %1867 = vmatpush.msra.mxu3 %v3889_v14  ;;  %1536 = vmatmul.f32.vlgmr.msrb.gmra.mxu1 %v3162_v58  ;;  %v4164_v58 = vld [vmem:[#allocation2_spill] sm:$0xff] }
 0x142   : > { %1888 = vmatpush.msrb.mxu0 %v1695_v38  ;;  %1951 = vmatpush.msrb.mxu1 %v3705_v30 }
 0x143   : > { %1832 = vmatpush.msra.mxu2 %v3947_v35  ;;  %1869 = vmatpush.msra.mxu3 %v3906_v61  ;;  %v2005_v35 = vld [vmem:[%s4111_s4 + $0x8] sm:$0xff] }
 0x144   : > { %1892 = vmatpush.msrb.mxu0 %v1701_v48  ;;  %1953 = vmatpush.msrb.mxu1 %v3715_v42  ;;  %v712_v42 = vpop.f32.mrf.mxu3 }
 0x145   : > { %1835 = vmatpush.msra.mxu2 %v3964_v63  ;;  %1871 = vmatpush.msra.mxu3 %v3919_v10 }
 0x146   : > { %1838 = vmatmul.f32.vlgmr.msra.gmra.mxu2 %v3388_v8  ;;  %1896 = vmatpush.msrb.mxu0 %v1707_v34  ;;  %v611_v8 = vpop.f32.mrf.mxu2 }
 0x147   : > { %1955 = vmatpush.msrb.mxu1 %v3725_v46  ;;  %1873 = vmatpush.msra.mxu3 %v3944_v53 }
 0x148   : > { %1683 = vmatmul.f32.vlgmr.msra.gmra.mxu0 %v3465_v19  ;;  %1877 = vmatmul.f32.vlgmr.msra.gmra.mxu3 %v4164_v58  ;;  %v572_v19 = vld [vmem:[%s4114_s7] sm:$0x1] }
 0x149   : > { %1900 = vmatpush.msrb.mxu0 %v1713_v27  ;;  %1957 = vmatpush.msrb.mxu1 %v3743_v39  ;;  %v612_v30 = vadd.f32 %v611_v8, %v572_v19  ;;  %v4166_v39 = vand.u32 4294901760, %v3917_v40  ;;  %v2006_v27 = vld [vmem:[%s4111_s4 + $0x10] sm:$0xff] }
 0x14a   : > { %2662 = vperm.xlu0 %2750, %v2657_v11   ;;  %1784 = vmatmul.f32.vlgmr.msra.gmra.mxu1 %v3368_v37 }
 0x14b   : > { %1904 = vmatpush.msrb.mxu0 %v1719_v12  ;;  %1959 = vmatpush.msrb.mxu1 %v3757_v22  ;;  %v713_v46 = vadd.f32 %v712_v42, %v612_v30  ;;  %v2026_v12 = vand.u32 4294901760, %v2006_v27 }
 0x14d   : > { %1908 = vmatpush.msrb.mxu0 %v1725_v29  ;;  %1961 = vmatpush.msrb.mxu1 %v3763_v16 }
 0x14e   : > { %2027 = vmatpush.msrb.mxu2 %v2026_v12 }
 0x14f   : > { %1912 = vmatpush.msrb.mxu0 %v1731_v32  ;;  %1963 = vmatpush.msrb.mxu1 %v3791_v6 }
 0x151   : > { %1916 = vmatpush.msrb.mxu0 %v1737_v47  ;;  %1965 = vmatpush.msrb.mxu1 %v3808_v20 }
 0x153   : > { %1920 = vmatpush.msrb.mxu0 %v1743_v36  ;;  %1967 = vmatpush.msrb.mxu1 %v3816_v44 }
 0x154   : > { %v766_v43 = vpop.f32.mrf.mxu0 }
 0x155   : > { %1924 = vmatpush.msrb.mxu0 %v1749_v33  ;;  %1969 = vmatpush.msrb.mxu1 %v3842_v24  ;;  %v767_v1 = vadd.f32 %v766_v43, %v713_v46  ;;  %v2004_v24 = vld [vmem:[%s4111_s4] sm:$0xff] }
 0x156   : > { %v805_v22 = vpop.f32.mrf.mxu1  ;;  %v874_v16 = vpop.f32.mrf.mxu2  ;;  %v2028_v23 = vand.u32 4294901760, %v2004_v24 }
 0x157   : > { %1928 = vmatpush.msrb.mxu0 %v4165_v55  ;;  %1971 = vmatpush.msrb.mxu1 %v3858_v45  ;;  %v806_v38 = vadd.f32 %v805_v22, %v767_v1 }
 0x158   : > { %v2060_v32 = vsub.f32 %v2004_v24, %v2028_v23  ;;  %2029 = vmatpush.msrb.mxu2 %v2028_v23  ;;  %v2330_v24 = vld [vmem:[%s4112_s5] sm:$0xff] }
 0x159   : > { %1932 = vmatpush.msrb.mxu0 %v4166_v39  ;;  %1973 = vmatpush.msrb.mxu1 %v3874_v0  ;;  %v875_v18 = vadd.f32 %v874_v16, %v806_v38  ;;  %v911_v48 = vpop.f32.mrf.mxu3  ;;  %v1304_v39 = vld [vmem:[%s4115_s8] sm:$0x1] }
 0x15a   : > { %v2061_v59 = vand.u32 4294901760, %v2060_v32 }
 0x15b   : > { %1936 = vmatpush.msrb.mxu0 %v4167_v62  ;;  %1975 = vmatpush.msrb.mxu1 %v3889_v14  ;;  %v912_v17 = vadd.f32 %v911_v48, %v875_v18 }
 0x15c   : > { %v2062_v36 = vsub.f32 %v2060_v32, %v2061_v59 }
 0x15d   : > { %1940 = vmatpush.msrb.mxu0 %v1773_v57  ;;  %1977 = vmatpush.msrb.mxu1 %v3906_v61  ;;  %v2007_v61 = vld [vmem:[%s4111_s4 + $0x18] sm:$0xff]  ;;  %v2187_v57 = vand.u32 4294901760, %v2005_v35 }
 0x15e   : > { %v952_v6 = vpop.f32.mrf.mxu0  ;;  %v2063_v33 = vand.u32 4294901760, %v2062_v36  ;;  %v2185_v40 = vand.u32 4294901760, %v2007_v61 }
 0x15f   : > { %1944 = vmatpush.msrb.mxu0 %v1779_v51  ;;  %1979 = vmatpush.msrb.mxu1 %v3919_v10  ;;  %v953_v13 = vadd.f32 %v952_v6, %v912_v17  ;;  %v2219_v51 = vsub.f32 %v2005_v35, %v2187_v57 }
 0x160   : > { %1946 = vmatmul.f32.vlgmr.msrb.gmra.mxu0 %v3368_v37  ;;  %v2213_v2 = vsub.f32 %v2007_v61, %v2185_v40  ;;  %v2333_v61 = vld [vmem:[%s4112_s5 + $0x18] sm:$0xff] }
 0x161   : > { %1981 = vmatpush.msrb.mxu1 %v3944_v53  ;;  %v1053_v34 = vpop.f32.mrf.mxu1  ;;  %v1107_v44 = vpop.f32.mrf.mxu2  ;;  %v2220_v9 = vand.u32 4294901760, %v2219_v51 }
 0x162   : > { %1983 = vmatmul.f32.vlgmr.msrb.gmra.mxu1 %v3368_v37  ;;  %v1054_v20 = vadd.f32 %v1053_v34, %v953_v13  ;;  %v2054_v37 = vsub.f32 %v2006_v27, %v2026_v12  ;;  %v2214_v63 = vand.u32 4294901760, %v2213_v2  ;;  %v2332_v27 = vld [vmem:[%s4112_s5 + $0x10] sm:$0xff] }
 0x163   : > { %2111 = vmatpush.msra.mxu1 %v2026_v12  ;;  %v2221_v31 = vsub.f32 %v2219_v51, %v2220_v9 }
 0x164   : > { %v1108_v4 = vadd.f32 %v1107_v44, %v1054_v20  ;;  %v1146_v25 = vpop.f32.mrf.mxu3  ;;  %v2055_v45 = vand.u32 4294901760, %v2054_v37  ;;  %2086 = vmatpush.msra.mxu0 %v2054_v37  ;;  %v2215_v56 = vsub.f32 %v2213_v2, %v2214_v63 }
 0x165   : > { %2113 = vmatpush.msra.mxu1 %v2028_v23  ;;  %v2222_v15 = vand.u32 4294901760, %v2221_v31 }
 0x166   : > { %v1147_v29 = vadd.f32 %v1146_v25, %v1108_v4  ;;  %v2056_v47 = vsub.f32 %v2054_v37, %v2055_v45  ;;  %2089 = vmatpush.msra.mxu0 %v2060_v32  ;;  %2138 = vmatpush.msra.mxu2 %v2055_v45  ;;  %v2216_v21 = vand.u32 4294901760, %v2215_v56 }
 0x168   : > { %v2057_v60 = vand.u32 4294901760, %v2056_v47  ;;  %2142 = vmatpush.msra.mxu2 %v2061_v59  ;;  %2186 = vmatpush.msrb.mxu0 %v2185_v40 }
 0x169   : > { %2217 = vmatpush.msrb.mxu1 %v2216_v21 }
 0x16a   : > { %2058 = vmatpush.msrb.mxu3 %v2057_v60  ;;  %2188 = vmatpush.msrb.mxu0 %v2187_v57 }
 0x16b   : > { %2223 = vmatpush.msrb.mxu1 %v2222_v15 }
 0x16c   : > { %2064 = vmatpush.msrb.mxu3 %v2063_v33 }
 0x16e   : > { %2163 = vmatpush.msra.mxu3 %v2026_v12  ;;  %v2351_v12 = vand.u32 4294901760, %v2332_v27 }
 0x170   : > { %2165 = vmatpush.msra.mxu3 %v2028_v23  ;;  %v2379_v37 = vsub.f32 %v2332_v27, %v2351_v12  ;;  %v2353_v23 = vand.u32 4294901760, %v2330_v24 }
 0x172   : > { %v2380_v45 = vand.u32 4294901760, %v2379_v37  ;;  %v2385_v32 = vsub.f32 %v2330_v24, %v2353_v23 }
 0x174   : > { %v2386_v47 = vand.u32 4294901760, %v2385_v32 }
 0x176   : > { %v2387_v60 = vsub.f32 %v2385_v32, %v2386_v47 }
 0x17a   : > { %v1215_v52 = vpop.f32.mrf.mxu0  ;;  %v1252_v14 = vpop.f32.mrf.mxu1 }
 0x17b   : > { %v1216_v0 = vadd.f32 %v1215_v52, %v1147_v29 }
 0x17d   : > { %v1253_v50 = vadd.f32 %v1252_v14, %v1216_v0  ;;  %v2381_v0 = vsub.f32 %v2379_v37, %v2380_v45 }
 0x17f   : > { %v1255_v10 = vand.u32 2147483647, %v1253_v50  ;;  %v2382_v14 = vand.u32 4294901760, %v2381_v0 }
 0x181   : > { %v1256_v53 = vadd.f32 1.0, %v1255_v10 }
 0x183   : > { %2753 = vrcp.f32 %v1256_v53  ;;  %v1268_v28 = vand.u32 2147483648, %v1256_v53  ;;  %v1266_v3 = vand.u32 2147483647, %v1256_v53  ;;  %vm1262_vm7 = vweird.f32 %v1256_v53 }
 0x185   : > { %v1269_v26 = vor.u32 1.1754944e-38, %v1268_v28  ;;  %vm1267_vm9 = vcmp.eq.f32.partialorder %v1266_v3, 8.507059e+37 }
 0x189   : > { %v2754_v7 = vpop.eup %2753 }
 0x18a   : > { %v1258_v5 = vmul.f32 %v2754_v7, %v1256_v53  ;;  %vm1263_vm6 = vweird.f32 %v2754_v7 }
 0x18b   : > { %vm1264_vm8 = vmor %vm1262_vm7, %vm1263_vm6 }
 0x18c   : > { %v1259_v49 = vsub.f32 1.0, %v1258_v5 }
 0x18e   : > { %v1260_v41 = vmul.f32 %v2754_v7, %v1259_v49 }
 0x190   : > { %v1261_v54 = vadd.f32 %v2754_v7, %v1260_v41 }
 0x192   : > { %v1265_v11 = vsel %vm1264_vm8, %v2754_v7, %v1261_v54 }
 0x193   : > { %v1270_v58 = vsel %vm1267_vm9, %v1269_v26, %v1265_v11 }
 0x194   : > { %v1271_v19 = vmul.f32 %v1270_v58, %v1253_v50  ;;  %v2388_v50 = vand.u32 4294901760, %v2387_v60 }
 0x196   : > { %v2010_v8 = vsel %vm2008_vm10, %v1271_v19, 0 }
 0x197   : > { %v2030_v30 = vand.u32 4294901760, %v2010_v8 }
 0x199   : > { %v2031_v42 = vsub.f32 %v2010_v8, %v2030_v30  ;;  %2066 = vmatmul.f32.vlgmr.msrb.gmra.mxu3 %v2030_v30 }
 0x19a   : > { %2270 = vmatpush.msrb.mxu3 %v2185_v40 }
 0x19b   : > { %2092 = vmatmul.f32.vlgmr.msra.gmra.mxu0 %v2031_v42  ;;  %v2032_v55 = vand.u32 4294901760, %v2031_v42 }
 0x19c   : > { %2272 = vmatpush.msrb.mxu3 %v2187_v57  ;;  %2297 = vmatpush.msra.mxu0 %v2214_v63 }
 0x19d   : > { %2117 = vmatmul.f32.vlgmr.msra.gmra.mxu1 %v2032_v55  ;;  %v2033_v46 = vsub.f32 %v2031_v42, %v2032_v55 }
 0x19e   : > { %2301 = vmatpush.msra.mxu0 %v2220_v9  ;;  %2322 = vmatpush.msra.mxu1 %v2185_v40  ;;  %v2510_v40 = vand.u32 4294901760, %v2333_v61 }
 0x19f   : > { %v2034_v43 = vand.u32 4294901760, %v2033_v46 }
 0x1a0   : > { %2324 = vmatpush.msra.mxu1 %v2187_v57  ;;  %v2538_v35 = vsub.f32 %v2333_v61, %v2510_v40 }
 0x1a1   : > { %2035 = vmatmul.f32.vlgmr.msrb.gmra.mxu2 %v2034_v43  ;;  %2167 = vmatmul.f32.vlgmr.msra.gmra.mxu3 %v2030_v30 }
 0x1a2   : > { %2245 = vmatpush.msrb.mxu2 %v2213_v2  ;;  %2383 = vmatpush.msra.mxu3 %v2382_v14  ;;  %v2331_v2 = vld [vmem:[%s4112_s5 + $0x8] sm:$0xff] }
 0x1a3   : > { %2194 = vmatmul.f32.vlgmr.msrb.gmra.mxu0 %v2034_v43  ;;  %v2512_v57 = vand.u32 4294901760, %v2331_v2 }
 0x1a4   : > { %2248 = vmatpush.msrb.mxu2 %v2219_v51  ;;  %2411 = vmatpush.msrb.mxu0 %v2379_v37  ;;  %v2539_v51 = vand.u32 4294901760, %v2538_v35 }
 0x1a5   : > { %2225 = vmatmul.f32.vlgmr.msrb.gmra.mxu1 %v2030_v30  ;;  %v1343_v62 = vpop.f32.mrf.mxu2  ;;  %2389 = vmatpush.msra.mxu3 %v2388_v50  ;;  %v2544_v21 = vsub.f32 %v2331_v2, %v2512_v57 }
 0x1a6   : > { %v1344_v1 = vadd.f32 %v1343_v62, %v1304_v39  ;;  %2436 = vmatpush.msrb.mxu1 %v2351_v12  ;;  %2414 = vmatpush.msrb.mxu0 %v2385_v32  ;;  %v2540_v31 = vsub.f32 %v2538_v35, %v2539_v51 }
 0x1a7   : > { %v2545_v7 = vand.u32 4294901760, %v2544_v21 }
 0x1a8   : > { %v1444_v22 = vpop.f32.mrf.mxu3  ;;  %2438 = vmatpush.msrb.mxu1 %v2353_v23  ;;  %v2541_v15 = vand.u32 4294901760, %v2540_v31 }
 0x1a9   : > { %2144 = vmatmul.f32.vlgmr.msra.gmra.mxu2 %v2030_v30  ;;  %2276 = vmatmul.f32.vlgmr.msrb.gmra.mxu3 %v2032_v55  ;;  %v1445_v38 = vadd.f32 %v1444_v22, %v1344_v1  ;;  %v2546_v49 = vsub.f32 %v2544_v21, %v2545_v7 }
 0x1aa   : > { %2352 = vmatpush.msra.mxu2 %v2351_v12  ;;  %2488 = vmatpush.msrb.mxu3 %v2351_v12 }
 0x1ab   : > { %2303 = vmatmul.f32.vlgmr.msra.gmra.mxu0 %v2030_v30  ;;  %v2547_v28 = vand.u32 4294901760, %v2546_v49 }
 0x1ac   : > { %2354 = vmatpush.msra.mxu2 %v2353_v23  ;;  %2511 = vmatpush.msra.mxu0 %v2510_v40 }
 0x1ad   : > { %2326 = vmatmul.f32.vlgmr.msra.gmra.mxu1 %v2030_v30  ;;  %2490 = vmatpush.msrb.mxu3 %v2353_v23 }
 0x1ae   : > { %2513 = vmatpush.msra.mxu0 %v2512_v57  ;;  %2542 = vmatpush.msra.mxu1 %v2541_v15 }
 0x1b0   : > { %2548 = vmatpush.msra.mxu1 %v2547_v28 }
 0x1b1   : > { %2251 = vmatmul.f32.vlgmr.msrb.gmra.mxu2 %v2031_v42 }
 0x1b2   : > { %2463 = vmatpush.msrb.mxu2 %v2380_v45 }
 0x1b4   : > { %2467 = vmatpush.msrb.mxu2 %v2386_v47 }
 0x1bb   : > { %v1498_v16 = vpop.f32.mrf.mxu0 }
 0x1bc   : > { %v1499_v18 = vadd.f32 %v1498_v16, %v1445_v38 }
 0x1be   : > { %v1537_v48 = vpop.f32.mrf.mxu1  ;;  %v1606_v6 = vpop.f32.mrf.mxu2 }
 0x1bf   : > { %v1538_v17 = vadd.f32 %v1537_v48, %v1499_v18 }
 0x1c1   : > { %v1607_v13 = vadd.f32 %v1606_v6, %v1538_v17 }
 0x1c2   : > { %v1643_v34 = vpop.f32.mrf.mxu3 }
 0x1c3   : > { %v1644_v20 = vadd.f32 %v1643_v34, %v1607_v13 }
 0x1c5   : > { %v1684_v44 = vpop.f32.mrf.mxu0 }
 0x1c6   : > { %v1685_v4 = vadd.f32 %v1684_v44, %v1644_v20 }
 0x1c7   : > { %v1785_v25 = vpop.f32.mrf.mxu1 }
 0x1c8   : > { %v1786_v29 = vadd.f32 %v1785_v25, %v1685_v4 }
 0x1c9   : > { %v1839_v52 = vpop.f32.mrf.mxu2 }
 0x1ca   : > { %v1840_v59 = vadd.f32 %v1839_v52, %v1786_v29 }
 0x1cb   : > { %v1878_v36 = vpop.f32.mrf.mxu3 }
 0x1cc   : > { %v1879_v33 = vadd.f32 %v1878_v36, %v1840_v59 }
 0x1dd   : > { %v1947_v10 = vpop.f32.mrf.mxu0 }
 0x1de   : > { %v1948_v53 = vadd.f32 %v1947_v10, %v1879_v33 }
 0x1df   : > { %v1984_v63 = vpop.f32.mrf.mxu1 }
 0x1e0   : > { %v1985_v56 = vadd.f32 %v1984_v63, %v1948_v53 }
 0x1e2   : > { %v1987_v9 = vand.u32 2147483647, %v1985_v56 }
 0x1e4   : > { %v1988_v5 = vadd.f32 1.0, %v1987_v9 }
 0x1e6   : > { %2755 = vrcp.f32 %v1988_v5  ;;  %v2000_v26 = vand.u32 2147483648, %v1988_v5  ;;  %v1998_v58 = vand.u32 2147483647, %v1988_v5  ;;  %vm1994_vm12 = vweird.f32 %v1988_v5 }
 0x1e8   : > { %v2001_v8 = vor.u32 1.1754944e-38, %v2000_v26  ;;  %vm1999_vm14 = vcmp.eq.f32.partialorder %v1998_v58, 8.507059e+37 }
 0x1ec   : > { %v2756_v41 = vpop.eup %2755 }
 0x1ed   : > { %v1990_v3 = vmul.f32 %v2756_v41, %v1988_v5  ;;  %vm1995_vm11 = vweird.f32 %v2756_v41 }
 0x1ee   : > { %vm1996_vm13 = vmor %vm1994_vm12, %vm1995_vm11 }
 0x1ef   : > { %v1991_v54 = vsub.f32 1.0, %v1990_v3  ;;  %v2663_v3 = vpop.permute.xlu0 %2662 }
 0x1f1   : > { %v1992_v11 = vmul.f32 %v2756_v41, %v1991_v54 }
 0x1f3   : > { %v1993_v19 = vadd.f32 %v2756_v41, %v1992_v11 }
 0x1f5   : > { %v1997_v30 = vsel %vm1996_vm13, %v2756_v41, %v1993_v19 }
 0x1f6   : > { %v2002_v42 = vsel %vm1999_vm14, %v2001_v8, %v1997_v30 }
 0x1f7   : > { %v2003_v55 = vmul.f32 %v2002_v42, %v1985_v56 }
 0x1f9   : > { %v2335_v46 = vsel %vm2008_vm10, %v2003_v55, 0 }
 0x1fa   : > { %v2355_v43 = vand.u32 4294901760, %v2335_v46 }
 0x1fc   : > { %v2356_v39 = vsub.f32 %v2335_v46, %v2355_v43  ;;  %2391 = vmatmul.f32.vlgmr.msra.gmra.mxu3 %v2355_v43 }
 0x1fd   : > { %2595 = vmatpush.msra.mxu3 %v2510_v40 }
 0x1fe   : > { %2417 = vmatmul.f32.vlgmr.msrb.gmra.mxu0 %v2356_v39  ;;  %v2357_v62 = vand.u32 4294901760, %v2356_v39 }
 0x1ff   : > { %2597 = vmatpush.msra.mxu3 %v2512_v57  ;;  %2622 = vmatpush.msrb.mxu0 %v2539_v51 }
 0x200   : > { %2442 = vmatmul.f32.vlgmr.msrb.gmra.mxu1 %v2357_v62  ;;  %v2358_v1 = vsub.f32 %v2356_v39, %v2357_v62 }
 0x201   : > { %2626 = vmatpush.msrb.mxu0 %v2545_v7  ;;  %2647 = vmatpush.msrb.mxu1 %v2510_v40 }
 0x202   : > { %v2359_v22 = vand.u32 4294901760, %v2358_v1 }
 0x203   : > { %2649 = vmatpush.msrb.mxu1 %v2512_v57 }
 0x204   : > { %2360 = vmatmul.f32.vlgmr.msra.gmra.mxu2 %v2359_v22  ;;  %2492 = vmatmul.f32.vlgmr.msrb.gmra.mxu3 %v2355_v43 }
 0x205   : > { %2570 = vmatpush.msra.mxu2 %v2538_v35 }
 0x206   : > { %2519 = vmatmul.f32.vlgmr.msra.gmra.mxu0 %v2359_v22 }
 0x207   : > { %2573 = vmatpush.msra.mxu2 %v2544_v21 }
 0x208   : > { %2550 = vmatmul.f32.vlgmr.msra.gmra.mxu1 %v2355_v43 }
 0x20c   : > { %2469 = vmatmul.f32.vlgmr.msrb.gmra.mxu2 %v2355_v43  ;;  %2601 = vmatmul.f32.vlgmr.msra.gmra.mxu3 %v2357_v62 }
 0x20e   : > { %2628 = vmatmul.f32.vlgmr.msrb.gmra.mxu0 %v2355_v43 }
 0x210   : > { %2651 = vmatmul.f32.vlgmr.msrb.gmra.mxu1 %v2355_v43 }
 0x214   : > { %2576 = vmatmul.f32.vlgmr.msra.gmra.mxu2 %v2356_v39 }
 0x218   : > { %v2093_v16 = vpop.f32.mrf.mxu0 }
 0x21a   : > { %v2118_v48 = vpop.f32.mrf.mxu1 }
 0x21c   : > { %v2067_v38 = vpop.f32.mrf.mxu3 }
 0x220   : > { %v2195_v6 = vpop.f32.mrf.mxu0 }
 0x222   : > { %v2226_v34 = vpop.f32.mrf.mxu1 }
 0x223   : > { %v2227_v52 = vadd.f32 %v2226_v34, %v2195_v6 }
 0x224   : > { %v2036_v18 = vpop.f32.mrf.mxu2  ;;  %v2168_v17 = vpop.f32.mrf.mxu3 }
 0x225   : > { %v2068_v29 = vadd.f32 %v2067_v38, %v2036_v18 }
 0x227   : > { %v2094_v59 = vadd.f32 %v2093_v16, %v2068_v29 }
 0x228   : > { %v2304_v44 = vpop.f32.mrf.mxu0 }
 0x229   : > { %v2119_v50 = vadd.f32 %v2118_v48, %v2094_v59 }
 0x22a   : > { %v2327_v4 = vpop.f32.mrf.mxu1 }
 0x22c   : > { %v2145_v13 = vpop.f32.mrf.mxu2  ;;  %v2277_v20 = vpop.f32.mrf.mxu3 }
 0x22d   : > { %v2146_v2 = vadd.f32 %v2145_v13, %v2119_v50 }
 0x22f   : > { %v2169_v21 = vadd.f32 %v2168_v17, %v2146_v2 }
 0x234   : > { %v2252_v27 = vpop.f32.mrf.mxu2 }
 0x235   : > { %v2253_v14 = vadd.f32 %v2252_v27, %v2227_v52 }
 0x237   : > { %v2278_v61 = vadd.f32 %v2277_v20, %v2253_v14 }
 0x239   : > { %v2305_v57 = vadd.f32 %v2304_v44, %v2278_v61 }
 0x23b   : > { %v2328_v7 = vadd.f32 %v2327_v4, %v2305_v57 }
 0x27b   : > { %v2418_v25 = vpop.f32.mrf.mxu0 }
 0x27d   : > { %v2443_v37 = vpop.f32.mrf.mxu1 }
 0x27f   : > { %v2392_v12 = vpop.f32.mrf.mxu3 }
 0x283   : > { %v2520_v47 = vpop.f32.mrf.mxu0 }
 0x285   : > { %v2551_v60 = vpop.f32.mrf.mxu1 }
 0x286   : > { %v2552_v33 = vadd.f32 %v2551_v60, %v2520_v47 }
 0x287   : > { %v2361_v24 = vpop.f32.mrf.mxu2  ;;  %v2493_v45 = vpop.f32.mrf.mxu3 }
 0x288   : > { %v2393_v23 = vadd.f32 %v2392_v12, %v2361_v24 }
 0x28a   : > { %v2419_v0 = vadd.f32 %v2418_v25, %v2393_v23 }
 0x28b   : > { %v2629_v51 = vpop.f32.mrf.mxu0 }
 0x28c   : > { %v2444_v36 = vadd.f32 %v2443_v37, %v2419_v0 }
 0x28d   : > { %v2652_v31 = vpop.f32.mrf.mxu1 }
 0x28f   : > { %v2470_v32 = vpop.f32.mrf.mxu2  ;;  %v2602_v35 = vpop.f32.mrf.mxu3 }
 0x290   : > { %v2471_v40 = vadd.f32 %v2470_v32, %v2444_v36 }
 0x292   : > { %v2494_v63 = vadd.f32 %v2493_v45, %v2471_v40 }
 0x294   : > { %v2655_v5 = vmul.f32 %v2494_v63, %v2169_v21 }
 0x296   : > { %v2664_v28 = vperm.slane %v2655_v5, 0 }
 0x297   : > { %v2577_v10 = vpop.f32.mrf.mxu2 }
 0x298   : > { %v2578_v53 = vadd.f32 %v2577_v10, %v2552_v33  ;;  %v2666_v26 = vmul.f32 %v2664_v28, %v2663_v3 }
 0x29a   : > { %v2603_v56 = vadd.f32 %v2602_v35, %v2578_v53 }
 0x29c   : > { %v2630_v9 = vadd.f32 %v2629_v51, %v2603_v56 }
 0x29e   : > { %v2653_v15 = vadd.f32 %v2652_v31, %v2630_v9 }
 0x2a0   : > { %v2656_v49 = vmul.f32 %v2653_v15, %v2328_v7 }
 0x2a2   : > { %v2665_v41 = vperm.slane %v2656_v49, 0 }
 0x2a4   : > { %v2667_v54 = vmul.f32 %v2665_v41, %v2663_v3 }
 0x2a6   : > { %v2670_v11 = vrot.slane %v2667_v54, 4 }
 0x2a8   : > { %v2671_v58 = vsel %vm340_vm0, %v2666_v26, %v2670_v11 }
 0x2a9   : > { %2673 = vst [vmem:[%s332_s25] sm:$0xff] %v2671_v58 }
 0x2aa PF: > { %s19_s30 = sadd.s32 1, %s2763_s30  }
 0x2ab   : > { %p16_p4 = scmp.ge.s32.totalorder %s19_s30, 4  }
 0x2ad   :  { %18 = sbr.rel (!%p16_p4) target bundleno = 1 (0x1), region = 86 }

</bundles_post_ra>
